<compile_context>
chip_gen: v7x
topology: tpu7x:2x2x1
jax: 0.10.0
libtpu: 0.0.40
codegen_flags: <defaults>
</compile_context>

<pallas_src>
import functools

import jax
import jax.numpy as jnp
from jax.experimental import pallas as pl
from jax.experimental.pallas import tpu as pltpu


# --------------------------------------------------------------------------- #
# Kernel
# --------------------------------------------------------------------------- #
def mlp_kernel(x_ref, *refs, num_layers, matmul_dtype):
    """Fused MLP body. refs = (w1, b1, w2, b2, ..., out_ref)."""
    out_ref = refs[2 * num_layers]
    h = x_ref[...].astype(jnp.float32)                    # (TB, d0)
    for layer in range(num_layers):
        w = refs[2 * layer][...]                          # (d_in, d_out) resident in VMEM
        b = refs[2 * layer + 1][...]                      # (1, d_out) f32, broadcasts
        # MXU matmul: operands optionally bf16, always f32 accumulation.
        h = jnp.dot(h.astype(matmul_dtype), w.astype(matmul_dtype),
                    preferred_element_type=jnp.float32) + b
        h = jnp.maximum(h, 0.0)                           # ReLU on the VPU (f32)
        # TODO(synk): nn.Dropout in training mode (inverted mask via
        # pltpu.prng_seed / pltpu.prng_random_bits with a per-step seed) is
        # omitted; this matches eval-mode Dropout (identity).
    out_ref[...] = h.astype(out_ref.dtype)


# --------------------------------------------------------------------------- #
# Helpers
# --------------------------------------------------------------------------- #
def _round_up(v, m):
    return ((v + m - 1) // m) * m


def _tensorcores_per_chip():
    """Best-effort detection of TensorCores per chip (v7x=2, v5e/v6e=1)."""
    try:
        d = jax.devices()[0]
    except Exception:
        return 1
    for attr in ("num_cores", "num_cores_per_chip"):
        n = getattr(d, attr, None)
        if isinstance(n, int) and 0 < n <= 8:
            return n
    kind = str(getattr(d, "device_kind", "")).lower()
    return 2 if "v7" in kind else 1


def _choose_batch_tile(batch, n_cores):
    """Generation-aware batch tile (rows per grid step), multiple of 8."""
    b8 = _round_up(batch, 8)
    if n_cores <= 1:
        # Single TC: one big step (per-step overhead dominates at these sizes).
        tb = min(b8, 512)
    else:
        per_core = -(-b8 // n_cores)        # ceil div
        if per_core <= 256:
            tb = per_core                   # exactly one step per TensorCore
        else:
            tb = 256                        # >=2 steps/core -> DMA/compute overlap
    return max(8, _round_up(tb, 8))


# --------------------------------------------------------------------------- #
# Wrapper
# --------------------------------------------------------------------------- #
def mlp_forward(x, weights, biases, *, batch_tile=None, use_bf16_matmul=False):
    """Fused-MLP forward.

    x:        (B, input_dim) float
    weights:  list of (d_in, d_out) arrays (already transposed vs. torch Linear)
    biases:   list of (d_out,) arrays
    """
    x = jnp.asarray(x, jnp.float32)
    B, d_in0 = x.shape
    num_layers = len(weights)
    out_dim = weights[-1].shape[1]

    # ---- pad every feature dim to a multiple of 128 (lane-dense) ----------
    dims = [d_in0] + [w.shape[1] for w in weights]
    pdims = [_round_up(d, 128) for d in dims]
    if pdims[0] != d_in0:
        x = jnp.pad(x, ((0, 0), (0, pdims[0] - d_in0)))

    pw, pb = [], []
    for li, (w, b) in enumerate(zip(weights, biases)):
        w = jnp.asarray(w, jnp.float32)
        b = jnp.asarray(b, jnp.float32)
        din, dout = w.shape
        w = jnp.pad(w, ((0, pdims[li] - din), (0, pdims[li + 1] - dout)))
        b = jnp.pad(b, ((0, pdims[li + 1] - dout),))
        pw.append(w)
        pb.append(b.reshape(1, -1))

    matmul_dtype = jnp.bfloat16 if use_bf16_matmul else jnp.float32
    if use_bf16_matmul:
        # Store weights bf16 in HBM: halves weight DMA; biases stay f32.
        pw = [w.astype(jnp.bfloat16) for w in pw]

    # ---- generation-aware batch tiling ------------------------------------
    n_cores = _tensorcores_per_chip()
    TB = batch_tile if batch_tile is not None else _choose_batch_tile(B, n_cores)
    TB = max(8, _round_up(min(TB, _round_up(B, 8)), 8))
    B_pad = _round_up(B, TB)
    if B_pad != B:
        x = jnp.pad(x, ((0, B_pad - B), (0, 0)))
    grid = (B_pad // TB,)

    # ---- cost estimate + VMEM budget guard ---------------------------------
    flops = 2 * B_pad * sum(pdims[i] * pdims[i + 1] for i in range(num_layers))
    weight_bytes = (sum(int(w.size) * w.dtype.itemsize for w in pw)
                    + sum(int(b.size) * 4 for b in pb))
    io_bytes = (int(x.size) * 4 + B_pad * pdims[-1] * 4)
    cost = pl.CostEstimate(flops=int(flops), transcendentals=0,
                           bytes_accessed=int(weight_bytes + io_bytes))

    resident = (2 * weight_bytes                              # worst case double-buffered
                + 2 * TB * (pdims[0] + pdims[-1]) * 4         # x / out double buffers
                + 2 * TB * max(pdims) * 4)                    # live activations
    compiler_kwargs = dict(dimension_semantics=("parallel",))
    if resident > 12 * 1024 * 1024:
        compiler_kwargs["vmem_limit_bytes"] = int(min(resident + (8 << 20), 64 << 20))

    # ---- specs --------------------------------------------------------------
    def param_specs(single_buffer):
        kw = {"pipeline_mode": pl.Buffered(1)} if single_buffer else {}
        specs = []
        for li in range(num_layers):
            din, dout = pdims[li], pdims[li + 1]
            # Full-array blocks -> fetched once, resident in VMEM across steps.
            specs.append(pl.BlockSpec((din, dout), lambda i: (0, 0), **kw))
            specs.append(pl.BlockSpec((1, dout), lambda i: (0, 0), **kw))
        return specs

    def build(single_buffer):
        kernel = functools.partial(mlp_kernel, num_layers=num_layers,
                                   matmul_dtype=matmul_dtype)
        return pl.pallas_call(
            kernel,
            out_shape=jax.ShapeDtypeStruct((B_pad, pdims[-1]), jnp.float32),
            grid_spec=pltpu.PrefetchScalarGridSpec(
                num_scalar_prefetch=0,
                grid=grid,
                in_specs=[pl.BlockSpec((TB, pdims[0]), lambda i: (i, 0))]
                         + param_specs(single_buffer),
                out_specs=pl.BlockSpec((TB, pdims[-1]), lambda i: (i, 0)),
            ),
            compiler_params=pltpu.CompilerParams(**compiler_kwargs),
            cost_estimate=cost,
        )

    args = [x]
    for w, b in zip(pw, pb):
        args.append(w)
        args.append(b)

    try:
        out = build(single_buffer=True)(*args)
    except Exception:
        # Fall back to default (double-buffered) specs if Buffered(1) is rejected.
        out = build(single_buffer=False)(*args)

    return out[:B, :out_dim]


# --------------------------------------------------------------------------- #
# Pure-JAX reference (eval mode: Dropout = identity)
# --------------------------------------------------------------------------- #
def reference_forward(x, weights, biases):
    h = x
    for w, b in zip(weights, biases):
        h = jnp.maximum(h @ w + b, 0.0)
    return h


# --------------------------------------------------------------------------- #
# Self-test
# --------------------------------------------------------------------------- #
if __name__ == "__main__":
    # MLP(fc_dims=(256, 128), input_dim=128, dropout=0.1), batch = 256.
    B, input_dim = 256, 128
    fc_dims = (256, 128)

    key = jax.random.PRNGKey(0)
    ks = jax.random.split(key, 1 + 2 * len(fc_dims))
    x = jax.random.normal(ks[0], (B, input_dim), jnp.float32)

    # torch.nn.Linear-like uniform(-1/sqrt(fan_in)) init (deterministic).
    weights, biases = [], []
    d_in = input_dim
    for li, d_out in enumerate(fc_dims):
        bound = (1.0 / d_in) ** 0.5
        w = jax.random.uniform(ks[1 + 2 * li], (d_in, d_out), jnp.float32,
                               minval=-bound, maxval=bound)
        b = jax.random.uniform(ks[2 + 2 * li], (d_out,), jnp.float32,
                               minval=-bound, maxval=bound)
        weights.append(w)
        biases.append(b)
        d_in = d_out

    ref = reference_forward(x, weights, biases)

    # 1) exact (f32 MXU operands) path
    out = jax.block_until_ready(mlp_forward(x, weights, biases))
    assert out.shape == ref.shape, (out.shape, ref.shape)
    err = float(jnp.max(jnp.abs(out - ref)))
    if err > 1e-4:
        raise AssertionError(f"MLP f32 output mismatch: max abs err {err}")

    # 2) bf16-MXU-operand path (f32 accumulation) — looser tolerance
    out_bf16 = jax.block_until_ready(
        mlp_forward(x, weights, biases, use_bf16_matmul=True))
    err_bf16 = float(jnp.max(jnp.abs(out_bf16 - ref)))
    if err_bf16 > 5e-2:
        raise AssertionError(f"MLP bf16 output mismatch: max abs err {err_bf16}")

    print("KERNEL_OK")
</pallas_src>

<mosaic_0001>
module attributes {stable_mosaic.version = 11 : i64} {
  func.func @mlp_kernel(%arg0: i32, %arg1: memref<256x128xf32, #tpu.memory_space<vmem>>, %arg2: memref<128x256xf32, #tpu.memory_space<vmem>>, %arg3: memref<1x256xf32, #tpu.memory_space<vmem>>, %arg4: memref<256x128xf32, #tpu.memory_space<vmem>>, %arg5: memref<1x128xf32, #tpu.memory_space<vmem>>, %arg6: memref<256x128xf32, #tpu.memory_space<vmem>>) attributes {dimension_semantics = [#tpu.dimension_semantics<parallel>], iteration_bounds = array<i64: 1>, scalar_prefetch = 0 : i64, scratch_operands = 0 : i64, tpu.core_type = #tpu.core_type<tc>, window_params = [{transform_indices = @transform_0, window_bounds = array<i64: 256, 128>}, {pipeline_mode = #tpu.pipeline_mode<synchronous>, transform_indices = @transform_1, window_bounds = array<i64: 128, 256>}, {pipeline_mode = #tpu.pipeline_mode<synchronous>, transform_indices = @transform_2, window_bounds = array<i64: 1, 256>}, {pipeline_mode = #tpu.pipeline_mode<synchronous>, transform_indices = @transform_3, window_bounds = array<i64: 256, 128>}, {pipeline_mode = #tpu.pipeline_mode<synchronous>, transform_indices = @transform_4, window_bounds = array<i64: 1, 128>}, {transform_indices = @transform_5, window_bounds = array<i64: 256, 128>}]} {
    %c0 = arith.constant 0 : index
    %c0_0 = arith.constant 0 : index
    %0 = vector.load %arg1[%c0, %c0_0] : memref<256x128xf32, #tpu.memory_space<vmem>>, vector<256x128xf32>
    %c0_1 = arith.constant 0 : index
    %c0_2 = arith.constant 0 : index
    %1 = vector.load %arg2[%c0_1, %c0_2] : memref<128x256xf32, #tpu.memory_space<vmem>>, vector<128x256xf32>
    %c0_3 = arith.constant 0 : index
    %c0_4 = arith.constant 0 : index
    %2 = vector.load %arg3[%c0_3, %c0_4] : memref<1x256xf32, #tpu.memory_space<vmem>>, vector<1x256xf32>
    %cst = arith.constant dense<0.000000e+00> : vector<256x256xf32>
    %3 = tpu.matmul %0, %1, %cst {dimension_numbers = #tpu.dot_dimension_numbers<[1], [0], [0], [1], [0, 0, 1, 1], [], []>} : vector<256x128xf32>, vector<128x256xf32>, vector<256x256xf32> -> vector<256x256xf32>
    %4 = vector.broadcast %2 : vector<1x256xf32> to vector<256x256xf32>
    %5 = arith.addf %3, %4 : vector<256x256xf32>
    %cst_5 = arith.constant 0.000000e+00 : f32
    %6 = vector.broadcast %cst_5 : f32 to vector<256x256xf32>
    %7 = arith.maximumf %5, %6 : vector<256x256xf32>
    %c0_6 = arith.constant 0 : index
    %c0_7 = arith.constant 0 : index
    %8 = vector.load %arg4[%c0_6, %c0_7] : memref<256x128xf32, #tpu.memory_space<vmem>>, vector<256x128xf32>
    %c0_8 = arith.constant 0 : index
    %c0_9 = arith.constant 0 : index
    %9 = vector.load %arg5[%c0_8, %c0_9] : memref<1x128xf32, #tpu.memory_space<vmem>>, vector<1x128xf32>
    %cst_10 = arith.constant dense<0.000000e+00> : vector<256x128xf32>
    %10 = tpu.matmul %7, %8, %cst_10 {dimension_numbers = #tpu.dot_dimension_numbers<[1], [0], [0], [1], [0, 0, 1, 1], [], []>} : vector<256x256xf32>, vector<256x128xf32>, vector<256x128xf32> -> vector<256x128xf32>
    %11 = vector.broadcast %9 : vector<1x128xf32> to vector<256x128xf32>
    %12 = arith.addf %10, %11 : vector<256x128xf32>
    %cst_11 = arith.constant 0.000000e+00 : f32
    %13 = vector.broadcast %cst_11 : f32 to vector<256x128xf32>
    %14 = arith.maximumf %12, %13 : vector<256x128xf32>
    %c0_12 = arith.constant 0 : index
    %c0_13 = arith.constant 0 : index
    %15 = vector.load %arg6[%c0_12, %c0_13] : memref<256x128xf32, #tpu.memory_space<vmem>>, vector<256x128xf32>
    tpu.vector_store %arg6[%c0_12, %c0_13], %14 {strides = array<i32>} : memref<256x128xf32, #tpu.memory_space<vmem>>, vector<256x128xf32>,
    return
  }
  func.func @transform_0(%arg0: i32) -> (i32, i32) {
    %c0_i32 = arith.constant 0 : i32
    %c0_i32_0 = arith.constant 0 : i32
    return %arg0, %c0_i32 : i32, i32
  }
  func.func @transform_1(%arg0: i32) -> (i32, i32) {
    %c0_i32 = arith.constant 0 : i32
    %c0_i32_0 = arith.constant 0 : i32
    %c0_i32_1 = arith.constant 0 : i32
    return %c0_i32, %c0_i32_0 : i32, i32
  }
  func.func @transform_2(%arg0: i32) -> (i32, i32) {
    %c0_i32 = arith.constant 0 : i32
    %c0_i32_0 = arith.constant 0 : i32
    %c0_i32_1 = arith.constant 0 : i32
    return %c0_i32, %c0_i32_0 : i32, i32
  }
  func.func @transform_3(%arg0: i32) -> (i32, i32) {
    %c0_i32 = arith.constant 0 : i32
    %c0_i32_0 = arith.constant 0 : i32
    %c0_i32_1 = arith.constant 0 : i32
    return %c0_i32, %c0_i32_0 : i32, i32
  }
  func.func @transform_4(%arg0: i32) -> (i32, i32) {
    %c0_i32 = arith.constant 0 : i32
    %c0_i32_0 = arith.constant 0 : i32
    %c0_i32_1 = arith.constant 0 : i32
    return %c0_i32, %c0_i32_0 : i32, i32
  }
  func.func @transform_5(%arg0: i32) -> (i32, i32) {
    %c0_i32 = arith.constant 0 : i32
    %c0_i32_0 = arith.constant 0 : i32
    return %arg0, %c0_i32 : i32, i32
  }
}

module attributes {stable_mosaic.version = 11 : i64} {
  func.func @mlp_kernel(%arg0: i32, %arg1: memref<256x128xf32, #tpu.memory_space<vmem>>, %arg2: memref<128x256xf32, #tpu.memory_space<vmem>>, %arg3: memref<1x256xf32, #tpu.memory_space<vmem>>, %arg4: memref<256x128xf32, #tpu.memory_space<vmem>>, %arg5: memref<1x128xf32, #tpu.memory_space<vmem>>, %arg6: memref<256x128xf32, #tpu.memory_space<vmem>>) attributes {dimension_semantics = [#tpu.dimension_semantics<parallel>], iteration_bounds = array<i64: 1>, scalar_prefetch = 0 : i64, scratch_operands = 0 : i64, tpu.core_type = #tpu.core_type<tc>, window_params = [{transform_indices = @transform_0, window_bounds = array<i64: 256, 128>}, {pipeline_mode = #tpu.pipeline_mode<synchronous>, transform_indices = @transform_1, window_bounds = array<i64: 128, 256>}, {pipeline_mode = #tpu.pipeline_mode<synchronous>, transform_indices = @transform_2, window_bounds = array<i64: 1, 256>}, {pipeline_mode = #tpu.pipeline_mode<synchronous>, transform_indices = @transform_3, window_bounds = array<i64: 256, 128>}, {pipeline_mode = #tpu.pipeline_mode<synchronous>, transform_indices = @transform_4, window_bounds = array<i64: 1, 128>}, {transform_indices = @transform_5, window_bounds = array<i64: 256, 128>}]} {
    %c0 = arith.constant 0 : index
    %c0_0 = arith.constant 0 : index
    %0 = vector.load %arg1[%c0, %c0_0] : memref<256x128xf32, #tpu.memory_space<vmem>>, vector<256x128xf32>
    %c0_1 = arith.constant 0 : index
    %c0_2 = arith.constant 0 : index
    %1 = vector.load %arg2[%c0_1, %c0_2] : memref<128x256xf32, #tpu.memory_space<vmem>>, vector<128x256xf32>
    %c0_3 = arith.constant 0 : index
    %c0_4 = arith.constant 0 : index
    %2 = vector.load %arg3[%c0_3, %c0_4] : memref<1x256xf32, #tpu.memory_space<vmem>>, vector<1x256xf32>
    %cst = arith.constant dense<0.000000e+00> : vector<256x256xf32>
    %3 = tpu.matmul %0, %1, %cst {dimension_numbers = #tpu.dot_dimension_numbers<[1], [0], [0], [1], [0, 0, 1, 1], [], []>} : vector<256x128xf32>, vector<128x256xf32>, vector<256x256xf32> -> vector<256x256xf32>
    %4 = vector.broadcast %2 : vector<1x256xf32> to vector<256x256xf32>
    %5 = arith.addf %3, %4 : vector<256x256xf32>
    %cst_5 = arith.constant 0.000000e+00 : f32
    %6 = vector.broadcast %cst_5 : f32 to vector<256x256xf32>
    %7 = arith.maximumf %5, %6 : vector<256x256xf32>
    %c0_6 = arith.constant 0 : index
    %c0_7 = arith.constant 0 : index
    %8 = vector.load %arg4[%c0_6, %c0_7] : memref<256x128xf32, #tpu.memory_space<vmem>>, vector<256x128xf32>
    %c0_8 = arith.constant 0 : index
    %c0_9 = arith.constant 0 : index
    %9 = vector.load %arg5[%c0_8, %c0_9] : memref<1x128xf32, #tpu.memory_space<vmem>>, vector<1x128xf32>
    %cst_10 = arith.constant dense<0.000000e+00> : vector<256x128xf32>
    %10 = tpu.matmul %7, %8, %cst_10 {dimension_numbers = #tpu.dot_dimension_numbers<[1], [0], [0], [1], [0, 0, 1, 1], [], []>} : vector<256x256xf32>, vector<256x128xf32>, vector<256x128xf32> -> vector<256x128xf32>
    %11 = vector.broadcast %9 : vector<1x128xf32> to vector<256x128xf32>
    %12 = arith.addf %10, %11 : vector<256x128xf32>
    %cst_11 = arith.constant 0.000000e+00 : f32
    %13 = vector.broadcast %cst_11 : f32 to vector<256x128xf32>
    %14 = arith.maximumf %12, %13 : vector<256x128xf32>
    %c0_12 = arith.constant 0 : index
    %c0_13 = arith.constant 0 : index
    %15 = vector.load %arg6[%c0_12, %c0_13] : memref<256x128xf32, #tpu.memory_space<vmem>>, vector<256x128xf32>
    tpu.vector_store %arg6[%c0_12, %c0_13], %14 {strides = array<i32>} : memref<256x128xf32, #tpu.memory_space<vmem>>, vector<256x128xf32>,
    return
  }
  func.func @transform_0(%arg0: i32) -> (i32, i32) {
    %c0_i32 = arith.constant 0 : i32
    %c0_i32_0 = arith.constant 0 : i32
    return %arg0, %c0_i32 : i32, i32
  }
  func.func @transform_1(%arg0: i32) -> (i32, i32) {
    %c0_i32 = arith.constant 0 : i32
    %c0_i32_0 = arith.constant 0 : i32
    %c0_i32_1 = arith.constant 0 : i32
    return %c0_i32, %c0_i32_0 : i32, i32
  }
  func.func @transform_2(%arg0: i32) -> (i32, i32) {
    %c0_i32 = arith.constant 0 : i32
    %c0_i32_0 = arith.constant 0 : i32
    %c0_i32_1 = arith.constant 0 : i32
    return %c0_i32, %c0_i32_0 : i32, i32
  }
  func.func @transform_3(%arg0: i32) -> (i32, i32) {
    %c0_i32 = arith.constant 0 : i32
    %c0_i32_0 = arith.constant 0 : i32
    %c0_i32_1 = arith.constant 0 : i32
    return %c0_i32, %c0_i32_0 : i32, i32
  }
  func.func @transform_4(%arg0: i32) -> (i32, i32) {
    %c0_i32 = arith.constant 0 : i32
    %c0_i32_0 = arith.constant 0 : i32
    %c0_i32_1 = arith.constant 0 : i32
    return %c0_i32, %c0_i32_0 : i32, i32
  }
  func.func @transform_5(%arg0: i32) -> (i32, i32) {
    %c0_i32 = arith.constant 0 : i32
    %c0_i32_0 = arith.constant 0 : i32
    return %arg0, %c0_i32 : i32, i32
  }
}

</mosaic_0001>

<bundles_post_ra>
// kernel: tpu_custom_call.1
= control target key start
LH: loop header
LB: loop body
LE: loop exit
PB: predicated region body
PF: predicated region fallthrough
CT: control target
= control target key end

     0   :  { %10 = vsyncpa [#allocation3], 0  ;;  %s1291_s0 = inlined_call_operand.hbm [shape: f32[256,128], index: 0, kind: input, shape index: {}]   ;;  %s1292_s1 = inlined_call_operand.hbm [shape: f32[128,256], index: 1, kind: input, shape index: {}]   ;;  %s1293_s2 = inlined_call_operand.vmem [shape: f32[1,256], index: 2, kind: input, shape index: {}]   ;;  %s1294_s3 = inlined_call_operand.hbm [shape: f32[256,128], index: 3, kind: input, shape index: {}]   ;;  %s1295_s4 = inlined_call_operand.vmem [shape: f32[1,128], index: 4, kind: input, shape index: {}]   ;;  %s1296_s5 = inlined_call_operand.hbm [shape: f32[256,128], index: 5, kind: output, shape index: {}]  }
   0x1   :  { %11 = vsyncpa [#allocation6], 0 }
   0x2   :  { %12 = vsyncpa [#allocation4], 0  ;;  %s1022_s18 = smov [#allocation5]   ;;  %s928_s22 = scalar_lea.hbm %s1292_s1, 4096 }
   0x3   :  { %s30_s19 = sshll.u32 %s1022_s18, 4  ;;  %p929_p0 = scmp.ne.s32.totalorder %s1292_s1, %s928_s22  ;;  %s31_s19 = int_to_ptr.vmem [resolvable:$true] %s30_s19 }
   0x4   :  { %p932_p1 = scmp.lt.u32.totalorder %s928_s22, %s1292_s1 }
   0x6   :  { %p934_p2 = pnand %p932_p1, %p929_p0 }
   0x8   :  { %937 = shalt.err (!%p934_p2)
}
   0x9   :  { %s938_s27 = scalar_lea.vmem %s31_s19, 4096  ;;  %p943_p4 = scmp.lt.s32.totalorder %s31_s19, %s31_s19 }
   0xa   :  { %p939_p3 = scmp.ne.s32.totalorder %s31_s19, %s938_s27  ;;  %p944_p5 = scmp.lt.s32.totalorder %s938_s27, %s938_s27 }
   0xc   :  { %p945_p6 = por %p944_p5, %p943_p4 }
   0xe   :  { %p946_p7 = pnand %p945_p6, %p939_p3 }
  0x10   :  { %949 = shalt.err (!%p946_p7)
}
  0x11   :  { %s1023_s28 = smov 256   ;;  %s1024_s29 = smov 16  }
  0x12   :  { %36 = dma.hbm_to_vmem [thread:$0]  %s1292_s1, 4096, %s31_s19, [#allocation6], %s1023_s28, %s1023_s28, %s1024_s29  }
  0x13   :  { %s1025_s7 = smov [#allocation2]   ;;  %s950_s11 = scalar_lea.hbm %s1291_s0, 4096 }
  0x14   :  { %s18_s8 = sshll.u32 %s1025_s7, 4  ;;  %p951_p8 = scmp.ne.s32.totalorder %s1291_s0, %s950_s11  ;;  %s19_s8 = int_to_ptr.vmem [resolvable:$true] %s18_s8 }
  0x15   :  { %p954_p9 = scmp.lt.u32.totalorder %s950_s11, %s1291_s0 }
  0x17   :  { %p956_p10 = pnand %p954_p9, %p951_p8 }
  0x19   :  { %959 = shalt.err (!%p956_p10)
}
  0x1a   :  { %s960_s16 = scalar_lea.vmem %s19_s8, 4096  ;;  %p965_p12 = scmp.lt.s32.totalorder %s19_s8, %s19_s8 }
  0x1b   :  { %p961_p11 = scmp.ne.s32.totalorder %s19_s8, %s960_s16  ;;  %p966_p13 = scmp.lt.s32.totalorder %s960_s16, %s960_s16 }
  0x1d   :  { %p967_p0 = por %p966_p13, %p965_p12 }
  0x1f   :  { %p968_p1 = pnand %p967_p0, %p961_p11 }
  0x21   :  { %971 = shalt.err (!%p968_p1)
}
  0x22   :  { %s1026_s1 = smov 128   ;;  %s1027_s17 = smov 8  }
  0x23   :  { %24 = dma.hbm_to_vmem [thread:$0]  %s1291_s0, 4096, %s19_s8, [#allocation3], %s1026_s1, %s1026_s1, %s1027_s17  }
  0x24   :  { %s1028_s20 = smov [#allocation7]   ;;  %s972_s24 = scalar_lea.hbm %s1294_s3, 4096 }
  0x25   :  { %s44_s21 = sshll.u32 %s1028_s20, 4  ;;  %p973_p2 = scmp.ne.s32.totalorder %s1294_s3, %s972_s24  ;;  %s45_s21 = int_to_ptr.vmem [resolvable:$true] %s44_s21 }
  0x26   :  { %p976_p3 = scmp.lt.u32.totalorder %s972_s24, %s1294_s3 }
  0x28   :  { %p978_p4 = pnand %p976_p3, %p973_p2 }
  0x2a   :  { %981 = shalt.err (!%p978_p4)
}
  0x2b   :  { %s982_s29 = scalar_lea.vmem %s45_s21, 4096  ;;  %p987_p6 = scmp.lt.s32.totalorder %s45_s21, %s45_s21 }
  0x2c   :  { %p983_p5 = scmp.ne.s32.totalorder %s45_s21, %s982_s29  ;;  %p988_p7 = scmp.lt.s32.totalorder %s982_s29, %s982_s29 }
  0x2e   :  { %p989_p8 = por %p988_p7, %p987_p6 }
  0x30   :  { %p990_p9 = pnand %p989_p8, %p983_p5 }
  0x32   :  { %993 = shalt.err (!%p990_p9)
}
  0x33   :  { %50 = dma.hbm_to_vmem [thread:$0]  %s1294_s3, 4096, %s45_s21, [#allocation6], %s1026_s1, %s1026_s1, %s1027_s17  }
  0x34   :  { %1016 = dma.done.wait [#allocation3], 4096  }
  0x35   :  { %1017 = vsyncadd [#allocation3], 4294963200 }
  0x36   :  { %1018 = dma.done.wait [#allocation6], 8192  }
  0x37   :  { %1019 = vsyncadd [#allocation6], 4294959104  ;;  %v1029_v0 = vmov 0.0   ;;  %v95_v1 = vld [vmem:[#allocation5 + $0x8] sm:$0xff]  ;;  %v97_v2 = vld [vmem:[#allocation5 + $0x18] sm:$0xff]  ;;  %v1030_v53 = vmov 0.0|0.0  }
  0x38   :  { %202 = vmatprep.mubr.f32.mxu0 %v1029_v0  ;;  %v94_v3 = vld [vmem:[#allocation5] sm:$0xff]  ;;  %v806_v4 = vpack.c.bf16 %v97_v2, %v95_v1  ;;  %v96_v5 = vld [vmem:[#allocation5 + $0x10] sm:$0xff]  ;;  %v99_v6 = vld [vmem:[#allocation5 + $0x28] sm:$0xff]  ;;  %886 = vmatprep.subr.bf16.mxu1 %v1030_v53 }
  0x39   :  { %v101_v7 = vld [vmem:[#allocation5 + $0x38] sm:$0xff]  ;;  %v808_v8 = vpack.c.bf16 %v96_v5, %v94_v3  ;;  %v98_v10 = vld [vmem:[#allocation5 + $0x20] sm:$0xff]  ;;  %v100_v11 = vld [vmem:[#allocation5 + $0x30] sm:$0xff] }
  0x3a   :  { %v810_v9 = vpack.c.bf16 %v101_v7, %v99_v6  ;;  %v103_v12 = vld [vmem:[#allocation5 + $0x48] sm:$0xff]  ;;  %807 = vmatprep.subr.bf16.mxu0 %v806_v4  ;;  %v105_v13 = vld [vmem:[#allocation5 + $0x58] sm:$0xff]  ;;  %v812_v14 = vpack.c.bf16 %v100_v11, %v98_v10  ;;  %v102_v16 = vld [vmem:[#allocation5 + $0x40] sm:$0xff] }
  0x3b   :  { %809 = vmatpush1.bf16.msra.mxu0 %v808_v8  ;;  %v814_v15 = vpack.c.bf16 %v105_v13, %v103_v12  ;;  %v104_v17 = vld [vmem:[#allocation5 + $0x50] sm:$0xff]  ;;  %v107_v18 = vld [vmem:[#allocation5 + $0x68] sm:$0xff]  ;;  %v109_v19 = vld [vmem:[#allocation5 + $0x78] sm:$0xff] }
  0x3c   :  { %811 = vmatprep.subr.bf16.mxu0 %v810_v9  ;;  %v816_v20 = vpack.c.bf16 %v104_v17, %v102_v16  ;;  %v818_v21 = vpack.c.bf16 %v109_v19, %v107_v18  ;;  %v106_v22 = vld [vmem:[#allocation5 + $0x60] sm:$0xff]  ;;  %v108_v23 = vld [vmem:[#allocation5 + $0x70] sm:$0xff]  ;;  %v111_v24 = vld [vmem:[#allocation5 + $0x88] sm:$0xff] }
  0x3d   :  { %v113_v25 = vld [vmem:[#allocation5 + $0x98] sm:$0xff]  ;;  %v820_v26 = vpack.c.bf16 %v108_v23, %v106_v22  ;;  %v110_v28 = vld [vmem:[#allocation5 + $0x80] sm:$0xff]  ;;  %v112_v29 = vld [vmem:[#allocation5 + $0x90] sm:$0xff] }
  0x3e   :  { %v822_v27 = vpack.c.bf16 %v113_v25, %v111_v24  ;;  %v115_v30 = vld [vmem:[#allocation5 + $0xa8] sm:$0xff]  ;;  %v117_v31 = vld [vmem:[#allocation5 + $0xb8] sm:$0xff]  ;;  %v824_v32 = vpack.c.bf16 %v112_v29, %v110_v28  ;;  %v114_v34 = vld [vmem:[#allocation5 + $0xa0] sm:$0xff] }
  0x3f   :  { %813 = vmatpush1.bf16.msra.mxu0 %v812_v14  ;;  %v826_v33 = vpack.c.bf16 %v117_v31, %v115_v30  ;;  %v116_v35 = vld [vmem:[#allocation5 + $0xb0] sm:$0xff]  ;;  %v119_v36 = vld [vmem:[#allocation5 + $0xc8] sm:$0xff]  ;;  %v121_v37 = vld [vmem:[#allocation5 + $0xd8] sm:$0xff] }
  0x40   :  { %815 = vmatprep.subr.bf16.mxu0 %v814_v15  ;;  %v828_v38 = vpack.c.bf16 %v116_v35, %v114_v34  ;;  %v830_v39 = vpack.c.bf16 %v121_v37, %v119_v36  ;;  %v118_v40 = vld [vmem:[#allocation5 + $0xc0] sm:$0xff]  ;;  %v120_v41 = vld [vmem:[#allocation5 + $0xd0] sm:$0xff]  ;;  %v123_v42 = vld [vmem:[#allocation5 + $0xe8] sm:$0xff] }
  0x41   :  { %v125_v43 = vld [vmem:[#allocation5 + $0xf8] sm:$0xff]  ;;  %v832_v44 = vpack.c.bf16 %v120_v41, %v118_v40  ;;  %v122_v46 = vld [vmem:[#allocation5 + $0xe0] sm:$0xff]  ;;  %v124_v47 = vld [vmem:[#allocation5 + $0xf0] sm:$0xff] }
  0x42   :  { %v834_v45 = vpack.c.bf16 %v125_v43, %v123_v42  ;;  %v836_v48 = vpack.c.bf16 %v124_v47, %v122_v46  ;;  %v459_v49 = vld [vmem:[#allocation7] sm:$0xff]  ;;  %v460_v50 = vld [vmem:[#allocation7 + $0x8] sm:$0xff]  ;;  %v461_v54 = vld [vmem:[#allocation7 + $0x10] sm:$0xff] }
  0x43   :  { %817 = vmatpush1.bf16.msra.mxu0 %v816_v20  ;;  %v62_v51 = vld [vmem:[#allocation2] sm:$0xff]  ;;  %v839_v52 = vpack.c.bf16 %v460_v50, %v459_v49  ;;  %v462_v55 = vld [vmem:[#allocation7 + $0x18] sm:$0xff]  ;;  %v63_v56 = vld [vmem:[#allocation2 + $0x8] sm:$0xff] }
  0x44   :  { %819 = vmatprep.subr.bf16.mxu0 %v818_v21  ;;  %v842_v57 = vpack.c.bf16 %v462_v55, %v461_v54  ;;  %v463_v58 = vld [vmem:[#allocation7 + $0x20] sm:$0xff]  ;;  %v464_v59 = vld [vmem:[#allocation7 + $0x28] sm:$0xff]  ;;  %v64_v60 = vld [vmem:[#allocation2 + $0x10] sm:$0xff] }
  0x45   :  { %902 = vmatpush1.bf16.msra.mxu1 %v839_v52  ;;  %v845_v61 = vpack.c.bf16 %v464_v59, %v463_v58  ;;  %v465_v62 = vld [vmem:[#allocation7 + $0x30] sm:$0xff]  ;;  %v466_v63 = vld [vmem:[#allocation7 + $0x38] sm:$0xff]  ;;  %v467_v3 = vld [vmem:[#allocation7 + $0x40] sm:$0xff] }
  0x46   :  { %887 = vmatprep.subr.bf16.mxu1 %v1030_v53  ;;  %v65_v1 = vld [vmem:[#allocation2 + $0x18] sm:$0xff]  ;;  %v848_v2 = vpack.c.bf16 %v466_v63, %v465_v62  ;;  %v468_v4 = vld [vmem:[#allocation7 + $0x48] sm:$0xff]  ;;  %v66_v5 = vld [vmem:[#allocation2 + $0x20] sm:$0xff] }
  0x47   :  { %821 = vmatpush1.bf16.msra.mxu0 %v820_v26  ;;  %v851_v6 = vpack.c.bf16 %v468_v4, %v467_v3  ;;  %v469_v7 = vld [vmem:[#allocation7 + $0x50] sm:$0xff]  ;;  %v470_v8 = vld [vmem:[#allocation7 + $0x58] sm:$0xff]  ;;  %v67_v9 = vld [vmem:[#allocation2 + $0x28] sm:$0xff]  ;;  %v128_v4 = vlaneseq }
  0x48   :  { %823 = vmatprep.subr.bf16.mxu0 %v822_v27  ;;  %v854_v10 = vpack.c.bf16 %v470_v8, %v469_v7  ;;  %v471_v11 = vld [vmem:[#allocation7 + $0x60] sm:$0xff]  ;;  %v472_v12 = vld [vmem:[#allocation7 + $0x68] sm:$0xff]  ;;  %v68_v13 = vld [vmem:[#allocation2 + $0x30] sm:$0xff] }
  0x49   :  { %903 = vmatpush1.bf16.msra.mxu1 %v842_v57  ;;  %v857_v14 = vpack.c.bf16 %v472_v12, %v471_v11  ;;  %v473_v15 = vld [vmem:[#allocation7 + $0x70] sm:$0xff]  ;;  %v474_v16 = vld [vmem:[#allocation7 + $0x78] sm:$0xff]  ;;  %v475_v19 = vld [vmem:[#allocation7 + $0x80] sm:$0xff] }
  0x4a   :  { %888 = vmatprep.subr.bf16.mxu1 %v1030_v53  ;;  %v69_v17 = vld [vmem:[#allocation2 + $0x38] sm:$0xff]  ;;  %v860_v18 = vpack.c.bf16 %v474_v16, %v473_v15  ;;  %v476_v20 = vld [vmem:[#allocation7 + $0x88] sm:$0xff]  ;;  %v70_v21 = vld [vmem:[#allocation2 + $0x40] sm:$0xff] }
  0x4b   :  { %825 = vmatpush1.bf16.msra.mxu0 %v824_v32  ;;  %v863_v22 = vpack.c.bf16 %v476_v20, %v475_v19  ;;  %v477_v23 = vld [vmem:[#allocation7 + $0x90] sm:$0xff]  ;;  %v478_v24 = vld [vmem:[#allocation7 + $0x98] sm:$0xff]  ;;  %v71_v25 = vld [vmem:[#allocation2 + $0x48] sm:$0xff] }
  0x4c   :  { %827 = vmatprep.subr.bf16.mxu0 %v826_v33  ;;  %v866_v26 = vpack.c.bf16 %v478_v24, %v477_v23  ;;  %v479_v27 = vld [vmem:[#allocation7 + $0xa0] sm:$0xff]  ;;  %v480_v28 = vld [vmem:[#allocation7 + $0xa8] sm:$0xff]  ;;  %v72_v29 = vld [vmem:[#allocation2 + $0x50] sm:$0xff] }
  0x4d   :  { %904 = vmatpush1.bf16.msra.mxu1 %v845_v61  ;;  %v869_v30 = vpack.c.bf16 %v480_v28, %v479_v27  ;;  %v481_v31 = vld [vmem:[#allocation7 + $0xb0] sm:$0xff]  ;;  %v482_v32 = vld [vmem:[#allocation7 + $0xb8] sm:$0xff]  ;;  %v483_v35 = vld [vmem:[#allocation7 + $0xc0] sm:$0xff] }
  0x4e   :  { %889 = vmatprep.subr.bf16.mxu1 %v1030_v53  ;;  %v73_v33 = vld [vmem:[#allocation2 + $0x58] sm:$0xff]  ;;  %v872_v34 = vpack.c.bf16 %v482_v32, %v481_v31  ;;  %v484_v36 = vld [vmem:[#allocation7 + $0xc8] sm:$0xff]  ;;  %v74_v37 = vld [vmem:[#allocation2 + $0x60] sm:$0xff] }
  0x4f   :  { %829 = vmatpush1.bf16.msra.mxu0 %v828_v38  ;;  %v875_v38 = vpack.c.bf16 %v484_v36, %v483_v35  ;;  %v486_v40 = vld [vmem:[#allocation7 + $0xd8] sm:$0xff]  ;;  %v75_v41 = vld [vmem:[#allocation2 + $0x68] sm:$0xff]  ;;  %v76_v43 = vld [vmem:[#allocation2 + $0x70] sm:$0xff] }
  0x50   :  { %831 = vmatprep.subr.bf16.mxu0 %v830_v39  ;;  %v485_v39 = vld [vmem:[#allocation7 + $0xd0] sm:$0xff]  ;;  %v79_v46 = vld [vmem:[#allocation2 + $0x88] sm:$0xff]  ;;  %v82_v49 = vld [vmem:[#allocation2 + $0xa0] sm:$0xff] }
  0x51   :  { %905 = vmatpush1.bf16.msra.mxu1 %v848_v2  ;;  %v878_v42 = vpack.c.bf16 %v486_v40, %v485_v39  ;;  %v80_v47 = vld [vmem:[#allocation2 + $0x90] sm:$0xff]  ;;  %v487_v50 = vld [vmem:[#allocation7 + $0xe0] sm:$0xff]  ;;  %v85_v59 = vld [vmem:[#allocation2 + $0xb8] sm:$0xff] }
  0x52   :  { %890 = vmatprep.subr.bf16.mxu1 %v1030_v53  ;;  %v489_v55 = vld [vmem:[#allocation7 + $0xf0] sm:$0xff]  ;;  %v90_v63 = vld [vmem:[#allocation2 + $0xe0] sm:$0xff]  ;;  %v93_v3 = vld [vmem:[#allocation2 + $0xf8] sm:$0xff] }
  0x53   :  { %833 = vmatpush1.bf16.msra.mxu0 %v832_v44  ;;  %v77_v44 = vld [vmem:[#allocation2 + $0x78] sm:$0xff]  ;;  %v88_v62 = vld [vmem:[#allocation2 + $0xd0] sm:$0xff]  ;;  %v126_v7 = vld [vmem:[%s1293_s2] sm:$0x3] }
  0x54   :  { %835 = vmatprep.subr.bf16.mxu0 %v834_v45  ;;  %v78_v45 = vld [vmem:[#allocation2 + $0x80] sm:$0xff] }
  0x55   :  { %906 = vmatpush1.bf16.msra.mxu1 %v851_v6 }
  0x56   :  { %891 = vmatprep.subr.bf16.mxu1 %v1030_v53 }
  0x57   :  { %837 = vmatpush1.bf16.msra.mxu0 %v836_v48  ;;  %v81_v48 = vld [vmem:[#allocation2 + $0x98] sm:$0xff] }
  0x58   :  { %838 = vmatprep.subr.bf16.mxu0 %v1030_v53 }
  0x59   :  { %907 = vmatpush1.bf16.msra.mxu1 %v854_v10 }
  0x5a   :  { %203 = vmatmul.mubr.f32.vlgmr.msra.gmra.mrb[0].mxu0 %v62_v51  ;;  %892 = vmatprep.subr.bf16.mxu1 %v1030_v53  ;;  %v488_v51 = vld [vmem:[#allocation7 + $0xe8] sm:$0xff] }
  0x5b   :  { %208 = vmatprep.mubr.f32.mxu0 %v1029_v0  ;;  %840 = vmatpush1.bf16.msra.mxu0 %v839_v52  ;;  %v83_v52 = vld [vmem:[#allocation2 + $0xa8] sm:$0xff]  ;;  %v881_v54 = vpack.c.bf16 %v488_v51, %v487_v50 }
  0x5c   :  { %841 = vmatprep.subr.bf16.mxu0 %v1030_v53 }
  0x5d   :  { %908 = vmatpush1.bf16.msra.mxu1 %v857_v14 }
  0x5e   :  { %209 = vmatmul.mubr.f32.gmra.mrb[2].mxu0 %v63_v56  ;;  %893 = vmatprep.subr.bf16.mxu1 %v1030_v53  ;;  %v490_v56 = vld [vmem:[#allocation7 + $0xf8] sm:$0xff] }
  0x5f   :  { %214 = vmatprep.mubr.f32.mxu0 %v1029_v0  ;;  %843 = vmatpush1.bf16.msra.mxu0 %v842_v57  ;;  %v84_v57 = vld [vmem:[#allocation2 + $0xb0] sm:$0xff]  ;;  %v884_v58 = vpack.c.bf16 %v490_v56, %v489_v55 }
  0x60   :  { %844 = vmatprep.subr.bf16.mxu0 %v1030_v53 }
  0x61   :  { %909 = vmatpush1.bf16.msra.mxu1 %v860_v18 }
  0x62   :  { %215 = vmatmul.mubr.f32.gmra.mrb[4].mxu0 %v64_v60  ;;  %894 = vmatprep.subr.bf16.mxu1 %v1030_v53  ;;  %v86_v60 = vld [vmem:[#allocation2 + $0xc0] sm:$0xff] }
  0x63   :  { %220 = vmatprep.mubr.f32.mxu0 %v1029_v0  ;;  %846 = vmatpush1.bf16.msra.mxu0 %v845_v61  ;;  %v87_v61 = vld [vmem:[#allocation2 + $0xc8] sm:$0xff] }
  0x64   :  { %847 = vmatprep.subr.bf16.mxu0 %v1030_v53 }
  0x65   :  { %910 = vmatpush1.bf16.msra.mxu1 %v863_v22 }
  0x66   :  { %221 = vmatmul.mubr.f32.gmra.mrb[6].mxu0 %v65_v1  ;;  %895 = vmatprep.subr.bf16.mxu1 %v1030_v53  ;;  %v91_v1 = vld [vmem:[#allocation2 + $0xe8] sm:$0xff] }
  0x67   :  { %226 = vmatprep.mubr.f32.mxu0 %v1029_v0  ;;  %849 = vmatpush1.bf16.msra.mxu0 %v848_v2  ;;  %v92_v2 = vld [vmem:[#allocation2 + $0xf0] sm:$0xff] }
  0x68   :  { %850 = vmatprep.subr.bf16.mxu0 %v1030_v53 }
  0x69   :  { %911 = vmatpush1.bf16.msra.mxu1 %v866_v26 }
  0x6a   :  { %227 = vmatmul.mubr.f32.gmra.mrb[8].mxu0 %v66_v5  ;;  %896 = vmatprep.subr.bf16.mxu1 %v1030_v53  ;;  %v129_v5 = vshrl.u32 %v128_v4, 7 }
  0x6b   :  { %232 = vmatprep.mubr.f32.mxu0 %v1029_v0  ;;  %852 = vmatpush1.bf16.msra.mxu0 %v851_v6 }
  0x6c   :  { %853 = vmatprep.subr.bf16.mxu0 %v1030_v53  ;;  %v130_v6 = vsub.s32 0, %v129_v5  ;;  %v134_v8 = vsub.s32 1, %v129_v5 }
  0x6d   :  { %912 = vmatpush1.bf16.msra.mxu1 %v869_v30 }
  0x6e   :  { %233 = vmatmul.mubr.f32.gmra.mrb[10].mxu0 %v67_v9  ;;  %897 = vmatprep.subr.bf16.mxu1 %v1030_v53  ;;  %v1171_v9 = vrot.slane %v126_v7, %v130_v6 }
  0x6f   :  { %238 = vmatprep.mubr.f32.mxu0 %v1029_v0  ;;  %855 = vmatpush1.bf16.msra.mxu0 %v854_v10  ;;  %v1173_v10 = vrot.slane %v126_v7, %v134_v8 }
  0x70   :  { %856 = vmatprep.subr.bf16.mxu0 %v1030_v53 }
  0x71   :  { %913 = vmatpush1.bf16.msra.mxu1 %v872_v34 }
  0x72   :  { %239 = vmatmul.mubr.f32.gmra.mrb[12].mxu0 %v68_v13  ;;  %898 = vmatprep.subr.bf16.mxu1 %v1030_v53 }
  0x73   :  { %244 = vmatprep.mubr.f32.mxu0 %v1029_v0  ;;  %858 = vmatpush1.bf16.msra.mxu0 %v857_v14 }
  0x74   :  { %859 = vmatprep.subr.bf16.mxu0 %v1030_v53 }
  0x75   :  { %914 = vmatpush1.bf16.msra.mxu1 %v875_v38 }
  0x76   :  { %245 = vmatmul.mubr.f32.gmra.mrb[14].mxu0 %v69_v17  ;;  %899 = vmatprep.subr.bf16.mxu1 %v1030_v53 }
  0x77   :  { %250 = vmatprep.mubr.f32.mxu0 %v1029_v0  ;;  %861 = vmatpush1.bf16.msra.mxu0 %v860_v18 }
  0x78   :  { %862 = vmatprep.subr.bf16.mxu0 %v1030_v53 }
  0x79   :  { %915 = vmatpush1.bf16.msra.mxu1 %v878_v42 }
  0x7a   :  { %251 = vmatmul.mubr.f32.gmra.mrb[16].mxu0 %v70_v21  ;;  %900 = vmatprep.subr.bf16.mxu1 %v1030_v53 }
  0x7b   :  { %256 = vmatprep.mubr.f32.mxu0 %v1029_v0  ;;  %864 = vmatpush1.bf16.msra.mxu0 %v863_v22 }
  0x7c   :  { %865 = vmatprep.subr.bf16.mxu0 %v1030_v53 }
  0x7d   :  { %916 = vmatpush1.bf16.msra.mxu1 %v881_v54 }
  0x7e   :  { %257 = vmatmul.mubr.f32.gmra.mrb[18].mxu0 %v71_v25  ;;  %901 = vmatprep.subr.bf16.mxu1 %v1030_v53 }
  0x7f   :  { %262 = vmatprep.mubr.f32.mxu0 %v1029_v0  ;;  %867 = vmatpush1.bf16.msra.mxu0 %v866_v26 }
  0x80   :  { %868 = vmatprep.subr.bf16.mxu0 %v1030_v53 }
  0x81   :  { %917 = vmatpush1.bf16.msra.mxu1 %v884_v58 }
  0x82   :  { %263 = vmatmul.mubr.f32.gmra.mrb[20].mxu0 %v72_v29 }
  0x83   :  { %268 = vmatprep.mubr.f32.mxu0 %v1029_v0  ;;  %870 = vmatpush1.bf16.msra.mxu0 %v869_v30 }
  0x84   :  { %871 = vmatprep.subr.bf16.mxu0 %v1030_v53 }
  0x86   :  { %269 = vmatmul.mubr.f32.gmra.mrb[22].mxu0 %v73_v33 }
  0x87   :  { %274 = vmatprep.mubr.f32.mxu0 %v1029_v0  ;;  %873 = vmatpush1.bf16.msra.mxu0 %v872_v34 }
  0x88   :  { %874 = vmatprep.subr.bf16.mxu0 %v1030_v53 }
  0x8a   :  { %275 = vmatmul.mubr.f32.gmra.mrb[24].mxu0 %v74_v37 }
  0x8b   :  { %280 = vmatprep.mubr.f32.mxu0 %v1029_v0  ;;  %876 = vmatpush1.bf16.msra.mxu0 %v875_v38 }
  0x8c   :  { %877 = vmatprep.subr.bf16.mxu0 %v1030_v53 }
  0x8e   :  { %281 = vmatmul.mubr.f32.gmra.mrb[26].mxu0 %v75_v41 }
  0x8f   :  { %286 = vmatprep.mubr.f32.mxu0 %v1029_v0  ;;  %879 = vmatpush1.bf16.msra.mxu0 %v878_v42 }
  0x90   :  { %880 = vmatprep.subr.bf16.mxu0 %v1030_v53 }
  0x92   :  { %287 = vmatmul.mubr.f32.gmra.mrb[28].mxu0 %v76_v43 }
  0x93   :  { %292 = vmatprep.mubr.f32.mxu0 %v1029_v0  ;;  %882 = vmatpush1.bf16.msra.mxu0 %v881_v54 }
  0x94   :  { %883 = vmatprep.subr.bf16.mxu0 %v1030_v53  ;;  %v89_v53 = vld [vmem:[#allocation2 + $0xd8] sm:$0xff] }
  0x96   :  { %293 = vmatmul.mubr.f32.gmra.mrb[30].mxu0 %v77_v44 }
  0x97   :  { %298 = vmatprep.mubr.f32.mxu0 %v1029_v0  ;;  %885 = vmatpush1.bf16.msra.mxu0 %v884_v58 }
  0x9a   :  { %299 = vmatmul.mubr.f32.gmra.mrb[32].mxu0 %v78_v45 }
  0x9b   :  { %304 = vmatprep.mubr.f32.mxu0 %v1029_v0 }
  0x9e   :  { %305 = vmatmul.mubr.f32.gmra.mrb[34].mxu0 %v79_v46 }
  0x9f   :  { %310 = vmatprep.mubr.f32.mxu0 %v1029_v0 }
  0xa2   :  { %311 = vmatmul.mubr.f32.gmra.mrb[36].mxu0 %v80_v47 }
  0xa3   :  { %316 = vmatprep.mubr.f32.mxu0 %v1029_v0 }
  0xa6   :  { %317 = vmatmul.mubr.f32.gmra.mrb[38].mxu0 %v81_v48 }
  0xa7   :  { %322 = vmatprep.mubr.f32.mxu0 %v1029_v0 }
  0xaa   :  { %323 = vmatmul.mubr.f32.gmra.mrb[40].mxu0 %v82_v49 }
  0xab   :  { %328 = vmatprep.mubr.f32.mxu0 %v1029_v0 }
  0xae   :  { %329 = vmatmul.mubr.f32.gmra.mrb[42].mxu0 %v83_v52 }
  0xaf   :  { %334 = vmatprep.mubr.f32.mxu0 %v1029_v0 }
  0xb2   :  { %335 = vmatmul.mubr.f32.gmra.mrb[44].mxu0 %v84_v57 }
  0xb3   :  { %340 = vmatprep.mubr.f32.mxu0 %v1029_v0 }
  0xb6   :  { %341 = vmatmul.mubr.f32.gmra.mrb[46].mxu0 %v85_v59 }
  0xb7   :  { %346 = vmatprep.mubr.f32.mxu0 %v1029_v0 }
  0xba   :  { %347 = vmatmul.mubr.f32.gmra.mrb[48].mxu0 %v86_v60 }
  0xbb   :  { %352 = vmatprep.mubr.f32.mxu0 %v1029_v0 }
  0xbe   :  { %353 = vmatmul.mubr.f32.gmra.mrb[50].mxu0 %v87_v61 }
  0xbf   :  { %358 = vmatprep.mubr.f32.mxu0 %v1029_v0 }
  0xc2   :  { %359 = vmatmul.mubr.f32.gmra.mrb[52].mxu0 %v88_v62 }
  0xc3   :  { %364 = vmatprep.mubr.f32.mxu0 %v1029_v0 }
  0xc6   :  { %365 = vmatmul.mubr.f32.gmra.mrb[54].mxu0 %v89_v53 }
  0xc7   :  { %370 = vmatprep.mubr.f32.mxu0 %v1029_v0 }
  0xca   :  { %371 = vmatmul.mubr.f32.gmra.mrb[56].mxu0 %v90_v63 }
  0xcb   :  { %376 = vmatprep.mubr.f32.mxu0 %v1029_v0 }
  0xce   :  { %377 = vmatmul.mubr.f32.gmra.mrb[58].mxu0 %v91_v1 }
  0xcf   :  { %382 = vmatprep.mubr.f32.mxu0 %v1029_v0 }
  0xd2   :  { %383 = vmatmul.mubr.f32.gmra.mrb[60].mxu0 %v92_v2 }
  0xd3   :  { %388 = vmatprep.mubr.f32.mxu0 %v1029_v0 }
  0xd6   :  { %389 = vmatmul.mubr.f32.gmra.mrb[62].mxu0 %v93_v3 }
 0x12d   :  { %v204_v11 = vpop.f32.mrb[0].mxu0 }
 0x12e   :  { %v205_v12 = vadd.f32 %v204_v11, %v1171_v9  ;;  %v206_v13 = vpop.f32.mrb[1].mxu0 }
 0x12f   :  { %v207_v0 = vadd.f32 %v206_v13, %v1173_v10 }
 0x130   :  { %v395_v16 = vmax.f32 %v205_v12, 0.0 }
 0x131   :  { %v396_v14 = vmax.f32 %v207_v0, 0.0  ;;  %v210_v15 = vpop.f32.mrb[2].mxu0 }
 0x132   :  { %v211_v17 = vadd.f32 %v210_v15, %v1171_v9  ;;  %v212_v18 = vpop.f32.mrb[3].mxu0 }
 0x133   :  { %v213_v19 = vadd.f32 %v212_v18, %v1173_v10  ;;  %562 = vmatprep.mubr.f32.mxu0 %v396_v14 }
 0x134   :  { %563 = vmatmul.mubr.f32.vlgmr.msra.gmra.mrb[64].mxu0 %v395_v16  ;;  %v397_v22 = vmax.f32 %v211_v17, 0.0 }
 0x135   :  { %v398_v20 = vmax.f32 %v213_v19, 0.0  ;;  %v216_v21 = vpop.f32.mrb[4].mxu0 }
 0x136   :  { %v217_v23 = vadd.f32 %v216_v21, %v1171_v9  ;;  %v218_v24 = vpop.f32.mrb[5].mxu0 }
 0x137   :  { %v219_v25 = vadd.f32 %v218_v24, %v1173_v10  ;;  %567 = vmatprep.mubr.f32.mxu0 %v398_v20 }
 0x138   :  { %568 = vmatmul.mubr.f32.gmra.mrb[66].mxu0 %v397_v22  ;;  %v399_v28 = vmax.f32 %v217_v23, 0.0 }
 0x139   :  { %v400_v26 = vmax.f32 %v219_v25, 0.0  ;;  %v222_v27 = vpop.f32.mrb[6].mxu0 }
 0x13a   :  { %v223_v29 = vadd.f32 %v222_v27, %v1171_v9  ;;  %v224_v30 = vpop.f32.mrb[7].mxu0 }
 0x13b   :  { %v225_v31 = vadd.f32 %v224_v30, %v1173_v10  ;;  %572 = vmatprep.mubr.f32.mxu0 %v400_v26 }
 0x13c   :  { %573 = vmatmul.mubr.f32.gmra.mrb[68].mxu0 %v399_v28  ;;  %v401_v34 = vmax.f32 %v223_v29, 0.0 }
 0x13d   :  { %v402_v32 = vmax.f32 %v225_v31, 0.0  ;;  %v228_v33 = vpop.f32.mrb[8].mxu0 }
 0x13e   :  { %v229_v35 = vadd.f32 %v228_v33, %v1171_v9  ;;  %v230_v36 = vpop.f32.mrb[9].mxu0 }
 0x13f   :  { %577 = vmatprep.mubr.f32.mxu0 %v402_v32  ;;  %v231_v37 = vadd.f32 %v230_v36, %v1173_v10 }
 0x140   :  { %578 = vmatmul.mubr.f32.gmra.mrb[70].mxu0 %v401_v34  ;;  %v403_v40 = vmax.f32 %v229_v35, 0.0 }
 0x141   :  { %v234_v38 = vpop.f32.mrb[10].mxu0  ;;  %v404_v39 = vmax.f32 %v231_v37, 0.0 }
 0x142   :  { %v235_v41 = vadd.f32 %v234_v38, %v1171_v9  ;;  %v236_v42 = vpop.f32.mrb[11].mxu0 }
 0x143   :  { %v237_v43 = vadd.f32 %v236_v42, %v1173_v10  ;;  %582 = vmatprep.mubr.f32.mxu1 %v404_v39 }
 0x144   :  { %583 = vmatmul.mubr.f32.vlgmr.msra.gmra.mrb[0].mxu1 %v403_v40  ;;  %v405_v46 = vmax.f32 %v235_v41, 0.0 }
 0x145   :  { %v406_v44 = vmax.f32 %v237_v43, 0.0  ;;  %v240_v45 = vpop.f32.mrb[12].mxu0 }
 0x146   :  { %v241_v47 = vadd.f32 %v240_v45, %v1171_v9  ;;  %v242_v48 = vpop.f32.mrb[13].mxu0 }
 0x147   :  { %v243_v49 = vadd.f32 %v242_v48, %v1173_v10  ;;  %587 = vmatprep.mubr.f32.mxu1 %v406_v44 }
 0x148   :  { %588 = vmatmul.mubr.f32.gmra.mrb[2].mxu1 %v405_v46  ;;  %v407_v52 = vmax.f32 %v241_v47, 0.0 }
 0x149   :  { %v408_v50 = vmax.f32 %v243_v49, 0.0  ;;  %v246_v51 = vpop.f32.mrb[14].mxu0 }
 0x14a   :  { %v247_v54 = vadd.f32 %v246_v51, %v1171_v9  ;;  %v248_v55 = vpop.f32.mrb[15].mxu0 }
 0x14b   :  { %v249_v56 = vadd.f32 %v248_v55, %v1173_v10  ;;  %592 = vmatprep.mubr.f32.mxu1 %v408_v50 }
 0x14c   :  { %593 = vmatmul.mubr.f32.gmra.mrb[4].mxu1 %v407_v52  ;;  %v409_v59 = vmax.f32 %v247_v54, 0.0 }
 0x14d   :  { %v410_v57 = vmax.f32 %v249_v56, 0.0  ;;  %v252_v58 = vpop.f32.mrb[16].mxu0 }
 0x14e   :  { %v253_v60 = vadd.f32 %v252_v58, %v1171_v9  ;;  %v254_v61 = vpop.f32.mrb[17].mxu0 }
 0x14f   :  { %v255_v62 = vadd.f32 %v254_v61, %v1173_v10  ;;  %597 = vmatprep.mubr.f32.mxu1 %v410_v57 }
 0x150   :  { %598 = vmatmul.mubr.f32.gmra.mrb[6].mxu1 %v409_v59  ;;  %v411_v1 = vmax.f32 %v253_v60, 0.0 }
 0x151   :  { %v412_v53 = vmax.f32 %v255_v62, 0.0  ;;  %v258_v63 = vpop.f32.mrb[18].mxu0 }
 0x152   :  { %v259_v2 = vadd.f32 %v258_v63, %v1171_v9  ;;  %v260_v3 = vpop.f32.mrb[19].mxu0 }
 0x153   :  { %v261_v4 = vadd.f32 %v260_v3, %v1173_v10  ;;  %602 = vmatprep.mubr.f32.mxu1 %v412_v53 }
 0x154   :  { %603 = vmatmul.mubr.f32.gmra.mrb[8].mxu1 %v411_v1  ;;  %v413_v7 = vmax.f32 %v259_v2, 0.0 }
 0x155   :  { %v414_v5 = vmax.f32 %v261_v4, 0.0  ;;  %v264_v6 = vpop.f32.mrb[20].mxu0 }
 0x156   :  { %v265_v8 = vadd.f32 %v264_v6, %v1171_v9  ;;  %v266_v11 = vpop.f32.mrb[21].mxu0 }
 0x157   :  { %v267_v12 = vadd.f32 %v266_v11, %v1173_v10  ;;  %607 = vmatprep.mubr.f32.mxu1 %v414_v5 }
 0x158   :  { %608 = vmatmul.mubr.f32.gmra.mrb[10].mxu1 %v413_v7  ;;  %v415_v14 = vmax.f32 %v265_v8, 0.0 }
 0x159   :  { %v416_v13 = vmax.f32 %v267_v12, 0.0  ;;  %v270_v0 = vpop.f32.mrb[22].mxu0 }
 0x15a   :  { %v271_v15 = vadd.f32 %v270_v0, %v1171_v9  ;;  %v272_v16 = vpop.f32.mrb[23].mxu0 }
 0x15b   :  { %v273_v17 = vadd.f32 %v272_v16, %v1173_v10  ;;  %612 = vmatprep.mubr.f32.mxu1 %v416_v13 }
 0x15c   :  { %613 = vmatmul.mubr.f32.gmra.mrb[12].mxu1 %v415_v14  ;;  %v417_v20 = vmax.f32 %v271_v15, 0.0 }
 0x15d   :  { %v418_v18 = vmax.f32 %v273_v17, 0.0  ;;  %v276_v19 = vpop.f32.mrb[24].mxu0 }
 0x15e   :  { %v277_v21 = vadd.f32 %v276_v19, %v1171_v9  ;;  %v278_v22 = vpop.f32.mrb[25].mxu0 }
 0x15f   :  { %v279_v23 = vadd.f32 %v278_v22, %v1173_v10  ;;  %617 = vmatprep.mubr.f32.mxu1 %v418_v18 }
 0x160   :  { %618 = vmatmul.mubr.f32.gmra.mrb[14].mxu1 %v417_v20  ;;  %v419_v26 = vmax.f32 %v277_v21, 0.0 }
 0x161   :  { %v420_v24 = vmax.f32 %v279_v23, 0.0  ;;  %v282_v25 = vpop.f32.mrb[26].mxu0 }
 0x162   :  { %v283_v27 = vadd.f32 %v282_v25, %v1171_v9  ;;  %v284_v28 = vpop.f32.mrb[27].mxu0 }
 0x163   :  { %v285_v29 = vadd.f32 %v284_v28, %v1173_v10  ;;  %622 = vmatprep.mubr.f32.mxu1 %v420_v24 }
 0x164   :  { %623 = vmatmul.mubr.f32.gmra.mrb[16].mxu1 %v419_v26  ;;  %v421_v32 = vmax.f32 %v283_v27, 0.0 }
 0x165   :  { %v422_v30 = vmax.f32 %v285_v29, 0.0  ;;  %v288_v31 = vpop.f32.mrb[28].mxu0 }
 0x166   :  { %v289_v33 = vadd.f32 %v288_v31, %v1171_v9  ;;  %v290_v34 = vpop.f32.mrb[29].mxu0 }
 0x167   :  { %v291_v35 = vadd.f32 %v290_v34, %v1173_v10  ;;  %627 = vmatprep.mubr.f32.mxu1 %v422_v30 }
 0x168   :  { %628 = vmatmul.mubr.f32.gmra.mrb[18].mxu1 %v421_v32  ;;  %v423_v38 = vmax.f32 %v289_v33, 0.0 }
 0x169   :  { %v424_v36 = vmax.f32 %v291_v35, 0.0  ;;  %v294_v37 = vpop.f32.mrb[30].mxu0 }
 0x16a   :  { %v295_v39 = vadd.f32 %v294_v37, %v1171_v9  ;;  %v296_v40 = vpop.f32.mrb[31].mxu0 }
 0x16b   :  { %v297_v41 = vadd.f32 %v296_v40, %v1173_v10  ;;  %632 = vmatprep.mubr.f32.mxu1 %v424_v36 }
 0x16c   :  { %633 = vmatmul.mubr.f32.gmra.mrb[20].mxu1 %v423_v38  ;;  %v425_v44 = vmax.f32 %v295_v39, 0.0 }
 0x16d   :  { %v426_v42 = vmax.f32 %v297_v41, 0.0  ;;  %v300_v43 = vpop.f32.mrb[32].mxu0 }
 0x16e   :  { %v301_v45 = vadd.f32 %v300_v43, %v1171_v9  ;;  %v302_v46 = vpop.f32.mrb[33].mxu0 }
 0x16f   :  { %v303_v47 = vadd.f32 %v302_v46, %v1173_v10  ;;  %637 = vmatprep.mubr.f32.mxu1 %v426_v42 }
 0x170   :  { %638 = vmatmul.mubr.f32.gmra.mrb[22].mxu1 %v425_v44  ;;  %v427_v50 = vmax.f32 %v301_v45, 0.0 }
 0x171   :  { %v428_v48 = vmax.f32 %v303_v47, 0.0  ;;  %v306_v49 = vpop.f32.mrb[34].mxu0 }
 0x172   :  { %v307_v51 = vadd.f32 %v306_v49, %v1171_v9  ;;  %v308_v52 = vpop.f32.mrb[35].mxu0 }
 0x173   :  { %v309_v54 = vadd.f32 %v308_v52, %v1173_v10  ;;  %642 = vmatprep.mubr.f32.mxu1 %v428_v48 }
 0x174   :  { %643 = vmatmul.mubr.f32.gmra.mrb[24].mxu1 %v427_v50  ;;  %v429_v57 = vmax.f32 %v307_v51, 0.0 }
 0x175   :  { %v430_v55 = vmax.f32 %v309_v54, 0.0  ;;  %v312_v56 = vpop.f32.mrb[36].mxu0 }
 0x176   :  { %v313_v58 = vadd.f32 %v312_v56, %v1171_v9  ;;  %v314_v59 = vpop.f32.mrb[37].mxu0 }
 0x177   :  { %v315_v60 = vadd.f32 %v314_v59, %v1173_v10  ;;  %647 = vmatprep.mubr.f32.mxu1 %v430_v55 }
 0x178   :  { %648 = vmatmul.mubr.f32.gmra.mrb[26].mxu1 %v429_v57  ;;  %v431_v53 = vmax.f32 %v313_v58, 0.0 }
 0x179   :  { %v432_v61 = vmax.f32 %v315_v60, 0.0  ;;  %v318_v62 = vpop.f32.mrb[38].mxu0 }
 0x17a   :  { %v319_v63 = vadd.f32 %v318_v62, %v1171_v9  ;;  %v320_v1 = vpop.f32.mrb[39].mxu0 }
 0x17b   :  { %v321_v2 = vadd.f32 %v320_v1, %v1173_v10  ;;  %652 = vmatprep.mubr.f32.mxu1 %v432_v61 }
 0x17c   :  { %653 = vmatmul.mubr.f32.gmra.mrb[28].mxu1 %v431_v53  ;;  %v433_v5 = vmax.f32 %v319_v63, 0.0 }
 0x17d   :  { %v434_v3 = vmax.f32 %v321_v2, 0.0  ;;  %v324_v4 = vpop.f32.mrb[40].mxu0 }
 0x17e   :  { %v325_v6 = vadd.f32 %v324_v4, %v1171_v9  ;;  %v326_v7 = vpop.f32.mrb[41].mxu0 }
 0x17f   :  { %v327_v8 = vadd.f32 %v326_v7, %v1173_v10  ;;  %657 = vmatprep.mubr.f32.mxu1 %v434_v3 }
 0x180   :  { %658 = vmatmul.mubr.f32.gmra.mrb[30].mxu1 %v433_v5  ;;  %v435_v13 = vmax.f32 %v325_v6, 0.0 }
 0x181   :  { %v436_v11 = vmax.f32 %v327_v8, 0.0  ;;  %v330_v12 = vpop.f32.mrb[42].mxu0 }
 0x182   :  { %v331_v0 = vadd.f32 %v330_v12, %v1171_v9  ;;  %v332_v14 = vpop.f32.mrb[43].mxu0 }
 0x183   :  { %v333_v15 = vadd.f32 %v332_v14, %v1173_v10  ;;  %662 = vmatprep.mubr.f32.mxu1 %v436_v11 }
 0x184   :  { %663 = vmatmul.mubr.f32.gmra.mrb[32].mxu1 %v435_v13  ;;  %v437_v18 = vmax.f32 %v331_v0, 0.0 }
 0x185   :  { %v438_v16 = vmax.f32 %v333_v15, 0.0  ;;  %v336_v17 = vpop.f32.mrb[44].mxu0 }
 0x186   :  { %v337_v19 = vadd.f32 %v336_v17, %v1171_v9  ;;  %v338_v20 = vpop.f32.mrb[45].mxu0 }
 0x187   :  { %v339_v21 = vadd.f32 %v338_v20, %v1173_v10  ;;  %667 = vmatprep.mubr.f32.mxu1 %v438_v16  ;;  %v1242_v16 = vld [vmem:[%s1295_s4] ss:$0 sm:$0xff]  ;;  %s1031_s4 = smov [#allocation8]  }
 0x188   :  { %668 = vmatmul.mubr.f32.gmra.mrb[34].mxu1 %v437_v18  ;;  %v439_v24 = vmax.f32 %v337_v19, 0.0  ;;  %s792_s8 = sshll.u32 %s1031_s4, 4  ;;  %s793_s8 = int_to_ptr.vmem [resolvable:$true] %s792_s8 }
 0x189   :  { %v440_v22 = vmax.f32 %v339_v21, 0.0  ;;  %v342_v23 = vpop.f32.mrb[46].mxu0  ;;  %s994_s9 = scalar_lea.vmem %s793_s8, 4096  ;;  %p999_p11 = scmp.lt.s32.totalorder %s793_s8, %s793_s8 }
 0x18a   :  { %v343_v25 = vadd.f32 %v342_v23, %v1171_v9  ;;  %v344_v26 = vpop.f32.mrb[47].mxu0  ;;  %p995_p10 = scmp.ne.s32.totalorder %s793_s8, %s994_s9  ;;  %p1000_p12 = scmp.lt.s32.totalorder %s994_s9, %s994_s9 }
 0x18b   :  { %v345_v27 = vadd.f32 %v344_v26, %v1173_v10  ;;  %672 = vmatprep.mubr.f32.mxu1 %v440_v22 }
 0x18c   :  { %673 = vmatmul.mubr.f32.gmra.mrb[36].mxu1 %v439_v24  ;;  %v441_v30 = vmax.f32 %v343_v25, 0.0  ;;  %p1001_p13 = por %p1000_p12, %p999_p11 }
 0x18d   :  { %v442_v28 = vmax.f32 %v345_v27, 0.0  ;;  %v348_v29 = vpop.f32.mrb[48].mxu0 }
 0x18e   :  { %v349_v31 = vadd.f32 %v348_v29, %v1171_v9  ;;  %v350_v32 = vpop.f32.mrb[49].mxu0  ;;  %p1002_p0 = pnand %p1001_p13, %p995_p10 }
 0x18f   :  { %v351_v33 = vadd.f32 %v350_v32, %v1173_v10  ;;  %677 = vmatprep.mubr.f32.mxu1 %v442_v28 }
 0x190   :  { %678 = vmatmul.mubr.f32.gmra.mrb[38].mxu1 %v441_v30  ;;  %v443_v36 = vmax.f32 %v349_v31, 0.0 }
 0x191   :  { %v444_v34 = vmax.f32 %v351_v33, 0.0  ;;  %v354_v35 = vpop.f32.mrb[50].mxu0 }
 0x192   :  { %v355_v37 = vadd.f32 %v354_v35, %v1171_v9  ;;  %v356_v38 = vpop.f32.mrb[51].mxu0 }
 0x193   :  { %v357_v39 = vadd.f32 %v356_v38, %v1173_v10  ;;  %682 = vmatprep.mubr.f32.mxu1 %v444_v34 }
 0x194   :  { %683 = vmatmul.mubr.f32.gmra.mrb[40].mxu1 %v443_v36  ;;  %v445_v42 = vmax.f32 %v355_v37, 0.0 }
 0x195   :  { %v446_v40 = vmax.f32 %v357_v39, 0.0  ;;  %v360_v41 = vpop.f32.mrb[52].mxu0 }
 0x196   :  { %v361_v43 = vadd.f32 %v360_v41, %v1171_v9  ;;  %v362_v44 = vpop.f32.mrb[53].mxu0 }
 0x197   :  { %v363_v45 = vadd.f32 %v362_v44, %v1173_v10  ;;  %687 = vmatprep.mubr.f32.mxu1 %v446_v40 }
 0x198   :  { %688 = vmatmul.mubr.f32.gmra.mrb[42].mxu1 %v445_v42  ;;  %v447_v48 = vmax.f32 %v361_v43, 0.0 }
 0x199   :  { %v448_v46 = vmax.f32 %v363_v45, 0.0  ;;  %v366_v47 = vpop.f32.mrb[54].mxu0 }
 0x19a   :  { %v367_v49 = vadd.f32 %v366_v47, %v1171_v9  ;;  %v368_v50 = vpop.f32.mrb[55].mxu0 }
 0x19b   :  { %v369_v51 = vadd.f32 %v368_v50, %v1173_v10  ;;  %692 = vmatprep.mubr.f32.mxu1 %v448_v46 }
 0x19c   :  { %693 = vmatmul.mubr.f32.gmra.mrb[44].mxu1 %v447_v48  ;;  %v449_v55 = vmax.f32 %v367_v49, 0.0 }
 0x19d   :  { %v450_v52 = vmax.f32 %v369_v51, 0.0  ;;  %v372_v54 = vpop.f32.mrb[56].mxu0 }
 0x19e   :  { %v373_v56 = vadd.f32 %v372_v54, %v1171_v9  ;;  %v374_v57 = vpop.f32.mrb[57].mxu0 }
 0x19f   :  { %v375_v58 = vadd.f32 %v374_v57, %v1173_v10  ;;  %697 = vmatprep.mubr.f32.mxu1 %v450_v52 }
 0x1a0   :  { %698 = vmatmul.mubr.f32.gmra.mrb[46].mxu1 %v449_v55  ;;  %v451_v61 = vmax.f32 %v373_v56, 0.0 }
 0x1a1   :  { %v452_v59 = vmax.f32 %v375_v58, 0.0  ;;  %v378_v60 = vpop.f32.mrb[58].mxu0 }
 0x1a2   :  { %v379_v62 = vadd.f32 %v378_v60, %v1171_v9  ;;  %v380_v53 = vpop.f32.mrb[59].mxu0 }
 0x1a3   :  { %v381_v63 = vadd.f32 %v380_v53, %v1173_v10  ;;  %702 = vmatprep.mubr.f32.mxu1 %v452_v59 }
 0x1a4   :  { %703 = vmatmul.mubr.f32.gmra.mrb[48].mxu1 %v451_v61  ;;  %v453_v3 = vmax.f32 %v379_v62, 0.0 }
 0x1a5   :  { %v454_v1 = vmax.f32 %v381_v63, 0.0  ;;  %v384_v2 = vpop.f32.mrb[60].mxu0 }
 0x1a6   :  { %v385_v4 = vadd.f32 %v384_v2, %v1171_v9  ;;  %v386_v5 = vpop.f32.mrb[61].mxu0 }
 0x1a7   :  { %v387_v6 = vadd.f32 %v386_v5, %v1173_v10  ;;  %707 = vmatprep.mubr.f32.mxu1 %v454_v1 }
 0x1a8   :  { %708 = vmatmul.mubr.f32.gmra.mrb[50].mxu1 %v453_v3  ;;  %v455_v11 = vmax.f32 %v385_v4, 0.0 }
 0x1a9   :  { %v456_v7 = vmax.f32 %v387_v6, 0.0  ;;  %v390_v8 = vpop.f32.mrb[62].mxu0 }
 0x1aa   :  { %v391_v12 = vadd.f32 %v390_v8, %v1171_v9  ;;  %v392_v13 = vpop.f32.mrb[63].mxu0 }
 0x1ab   :  { %v393_v0 = vadd.f32 %v392_v13, %v1173_v10  ;;  %712 = vmatprep.mubr.f32.mxu1 %v456_v7 }
 0x1ac   :  { %713 = vmatmul.mubr.f32.gmra.mrb[52].mxu1 %v455_v11  ;;  %v457_v15 = vmax.f32 %v391_v12, 0.0 }
 0x1ad   :  { %v458_v14 = vmax.f32 %v393_v0, 0.0 }
 0x1af   :  { %717 = vmatprep.mubr.f32.mxu1 %v458_v14 }
 0x1b0   :  { %718 = vmatmul.mubr.f32.gmra.mrb[54].mxu1 %v457_v15 }
 0x207   :  { %v564_v17 = vpop.f32.mrb[64].mxu0 }
 0x208   :  { %v565_v18 = vadd.f32 %v1242_v16, %v564_v17  ;;  %v566_v19 = vpop.f32.mrb[65].mxu0 }
 0x20a   :  { %v723_v20 = vmax.f32 %v565_v18, 0.0 }
 0x20b   :  { %v569_v9 = vpop.f32.mrb[66].mxu0 }
 0x20c   :  { %755 = vst [vmem:[#allocation8] sm:$0xff] %v723_v20  ;;  %v570_v10 = vadd.f32 %v1242_v16, %v569_v9  ;;  %v571_v21 = vpop.f32.mrb[67].mxu0 }
 0x20e   :  { %v724_v22 = vmax.f32 %v570_v10, 0.0 }
 0x20f   :  { %v574_v23 = vpop.f32.mrb[68].mxu0 }
 0x210   :  { %756 = vst [vmem:[#allocation8 + $0x8] sm:$0xff] %v724_v22  ;;  %v575_v24 = vadd.f32 %v1242_v16, %v574_v23  ;;  %v576_v25 = vpop.f32.mrb[69].mxu0 }
 0x212   :  { %v725_v26 = vmax.f32 %v575_v24, 0.0 }
 0x213   :  { %v579_v27 = vpop.f32.mrb[70].mxu0 }
 0x214   :  { %757 = vst [vmem:[#allocation8 + $0x10] sm:$0xff] %v725_v26  ;;  %v580_v28 = vadd.f32 %v1242_v16, %v579_v27  ;;  %v581_v29 = vpop.f32.mrb[71].mxu0 }
 0x216   :  { %v726_v30 = vmax.f32 %v580_v28, 0.0 }
 0x217   :  { %v584_v31 = vpop.f32.mrb[0].mxu1 }
 0x218   :  { %758 = vst [vmem:[#allocation8 + $0x18] sm:$0xff] %v726_v30  ;;  %v585_v32 = vadd.f32 %v1242_v16, %v584_v31  ;;  %v586_v33 = vpop.f32.mrb[1].mxu1 }
 0x21a   :  { %v727_v34 = vmax.f32 %v585_v32, 0.0 }
 0x21b   :  { %v589_v35 = vpop.f32.mrb[2].mxu1 }
 0x21c   :  { %759 = vst [vmem:[#allocation8 + $0x20] sm:$0xff] %v727_v34  ;;  %v590_v36 = vadd.f32 %v1242_v16, %v589_v35  ;;  %v591_v37 = vpop.f32.mrb[3].mxu1 }
 0x21e   :  { %v728_v38 = vmax.f32 %v590_v36, 0.0 }
 0x21f   :  { %v594_v39 = vpop.f32.mrb[4].mxu1 }
 0x220   :  { %760 = vst [vmem:[#allocation8 + $0x28] sm:$0xff] %v728_v38  ;;  %v595_v40 = vadd.f32 %v1242_v16, %v594_v39  ;;  %v596_v41 = vpop.f32.mrb[5].mxu1 }
 0x222   :  { %v729_v42 = vmax.f32 %v595_v40, 0.0 }
 0x223   :  { %v599_v43 = vpop.f32.mrb[6].mxu1 }
 0x224   :  { %761 = vst [vmem:[#allocation8 + $0x30] sm:$0xff] %v729_v42  ;;  %v600_v44 = vadd.f32 %v1242_v16, %v599_v43  ;;  %v601_v45 = vpop.f32.mrb[7].mxu1 }
 0x226   :  { %v730_v46 = vmax.f32 %v600_v44, 0.0 }
 0x227   :  { %v604_v47 = vpop.f32.mrb[8].mxu1 }
 0x228   :  { %762 = vst [vmem:[#allocation8 + $0x38] sm:$0xff] %v730_v46  ;;  %v605_v48 = vadd.f32 %v1242_v16, %v604_v47  ;;  %v606_v49 = vpop.f32.mrb[9].mxu1 }
 0x22a   :  { %v731_v50 = vmax.f32 %v605_v48, 0.0 }
 0x22b   :  { %v609_v51 = vpop.f32.mrb[10].mxu1 }
 0x22c   :  { %763 = vst [vmem:[#allocation8 + $0x40] sm:$0xff] %v731_v50  ;;  %v610_v52 = vadd.f32 %v1242_v16, %v609_v51  ;;  %v611_v54 = vpop.f32.mrb[11].mxu1 }
 0x22e   :  { %v732_v55 = vmax.f32 %v610_v52, 0.0 }
 0x22f   :  { %v614_v56 = vpop.f32.mrb[12].mxu1 }
 0x230   :  { %764 = vst [vmem:[#allocation8 + $0x48] sm:$0xff] %v732_v55  ;;  %v615_v57 = vadd.f32 %v1242_v16, %v614_v56  ;;  %v616_v58 = vpop.f32.mrb[13].mxu1 }
 0x232   :  { %v733_v59 = vmax.f32 %v615_v57, 0.0 }
 0x233   :  { %v619_v60 = vpop.f32.mrb[14].mxu1 }
 0x234   :  { %765 = vst [vmem:[#allocation8 + $0x50] sm:$0xff] %v733_v59  ;;  %v620_v61 = vadd.f32 %v1242_v16, %v619_v60  ;;  %v621_v62 = vpop.f32.mrb[15].mxu1 }
 0x236   :  { %v734_v53 = vmax.f32 %v620_v61, 0.0 }
 0x237   :  { %v624_v63 = vpop.f32.mrb[16].mxu1 }
 0x238   :  { %766 = vst [vmem:[#allocation8 + $0x58] sm:$0xff] %v734_v53  ;;  %v625_v1 = vadd.f32 %v1242_v16, %v624_v63  ;;  %v626_v2 = vpop.f32.mrb[17].mxu1 }
 0x23a   :  { %v735_v3 = vmax.f32 %v625_v1, 0.0 }
 0x23b   :  { %v629_v4 = vpop.f32.mrb[18].mxu1 }
 0x23c   :  { %767 = vst [vmem:[#allocation8 + $0x60] sm:$0xff] %v735_v3  ;;  %v630_v5 = vadd.f32 %v1242_v16, %v629_v4  ;;  %v631_v6 = vpop.f32.mrb[19].mxu1 }
 0x23e   :  { %v736_v7 = vmax.f32 %v630_v5, 0.0 }
 0x23f   :  { %v634_v8 = vpop.f32.mrb[20].mxu1 }
 0x240   :  { %768 = vst [vmem:[#allocation8 + $0x68] sm:$0xff] %v736_v7  ;;  %v635_v11 = vadd.f32 %v1242_v16, %v634_v8  ;;  %v636_v12 = vpop.f32.mrb[21].mxu1 }
 0x242   :  { %v737_v13 = vmax.f32 %v635_v11, 0.0 }
 0x243   :  { %v639_v0 = vpop.f32.mrb[22].mxu1 }
 0x244   :  { %769 = vst [vmem:[#allocation8 + $0x70] sm:$0xff] %v737_v13  ;;  %v640_v14 = vadd.f32 %v1242_v16, %v639_v0  ;;  %v641_v15 = vpop.f32.mrb[23].mxu1 }
 0x246   :  { %v738_v17 = vmax.f32 %v640_v14, 0.0 }
 0x247   :  { %v644_v18 = vpop.f32.mrb[24].mxu1 }
 0x248   :  { %770 = vst [vmem:[#allocation8 + $0x78] sm:$0xff] %v738_v17  ;;  %v645_v19 = vadd.f32 %v1242_v16, %v644_v18  ;;  %v646_v20 = vpop.f32.mrb[25].mxu1 }
 0x24a   :  { %v739_v9 = vmax.f32 %v645_v19, 0.0 }
 0x24b   :  { %v649_v10 = vpop.f32.mrb[26].mxu1 }
 0x24c   :  { %771 = vst [vmem:[#allocation8 + $0x80] sm:$0xff] %v739_v9  ;;  %v650_v21 = vadd.f32 %v1242_v16, %v649_v10  ;;  %v651_v22 = vpop.f32.mrb[27].mxu1 }
 0x24e   :  { %v740_v23 = vmax.f32 %v650_v21, 0.0 }
 0x24f   :  { %v654_v24 = vpop.f32.mrb[28].mxu1 }
 0x250   :  { %772 = vst [vmem:[#allocation8 + $0x88] sm:$0xff] %v740_v23  ;;  %v655_v25 = vadd.f32 %v1242_v16, %v654_v24  ;;  %v656_v26 = vpop.f32.mrb[29].mxu1 }
 0x252   :  { %v741_v27 = vmax.f32 %v655_v25, 0.0 }
 0x253   :  { %v659_v28 = vpop.f32.mrb[30].mxu1 }
 0x254   :  { %773 = vst [vmem:[#allocation8 + $0x90] sm:$0xff] %v741_v27  ;;  %v660_v29 = vadd.f32 %v1242_v16, %v659_v28  ;;  %v661_v30 = vpop.f32.mrb[31].mxu1 }
 0x256   :  { %v742_v31 = vmax.f32 %v660_v29, 0.0 }
 0x257   :  { %v664_v32 = vpop.f32.mrb[32].mxu1 }
 0x258   :  { %774 = vst [vmem:[#allocation8 + $0x98] sm:$0xff] %v742_v31  ;;  %v665_v33 = vadd.f32 %v1242_v16, %v664_v32  ;;  %v666_v34 = vpop.f32.mrb[33].mxu1 }
 0x25a   :  { %v743_v35 = vmax.f32 %v665_v33, 0.0 }
 0x25b   :  { %v669_v36 = vpop.f32.mrb[34].mxu1 }
 0x25c   :  { %775 = vst [vmem:[#allocation8 + $0xa0] sm:$0xff] %v743_v35  ;;  %v670_v37 = vadd.f32 %v1242_v16, %v669_v36  ;;  %v671_v38 = vpop.f32.mrb[35].mxu1 }
 0x25e   :  { %v744_v39 = vmax.f32 %v670_v37, 0.0 }
 0x25f   :  { %v674_v40 = vpop.f32.mrb[36].mxu1 }
 0x260   :  { %776 = vst [vmem:[#allocation8 + $0xa8] sm:$0xff] %v744_v39  ;;  %v675_v41 = vadd.f32 %v1242_v16, %v674_v40  ;;  %v676_v42 = vpop.f32.mrb[37].mxu1 }
 0x262   :  { %v745_v43 = vmax.f32 %v675_v41, 0.0 }
 0x263   :  { %v679_v44 = vpop.f32.mrb[38].mxu1 }
 0x264   :  { %777 = vst [vmem:[#allocation8 + $0xb0] sm:$0xff] %v745_v43  ;;  %v680_v45 = vadd.f32 %v1242_v16, %v679_v44  ;;  %v681_v46 = vpop.f32.mrb[39].mxu1 }
 0x266   :  { %v746_v47 = vmax.f32 %v680_v45, 0.0 }
 0x267   :  { %v684_v48 = vpop.f32.mrb[40].mxu1 }
 0x268   :  { %778 = vst [vmem:[#allocation8 + $0xb8] sm:$0xff] %v746_v47  ;;  %v685_v49 = vadd.f32 %v1242_v16, %v684_v48  ;;  %v686_v50 = vpop.f32.mrb[41].mxu1 }
 0x26a   :  { %v747_v51 = vmax.f32 %v685_v49, 0.0 }
 0x26b   :  { %v689_v52 = vpop.f32.mrb[42].mxu1 }
 0x26c   :  { %779 = vst [vmem:[#allocation8 + $0xc0] sm:$0xff] %v747_v51  ;;  %v690_v54 = vadd.f32 %v1242_v16, %v689_v52  ;;  %v691_v55 = vpop.f32.mrb[43].mxu1 }
 0x26e   :  { %v748_v56 = vmax.f32 %v690_v54, 0.0 }
 0x26f   :  { %v694_v57 = vpop.f32.mrb[44].mxu1 }
 0x270   :  { %780 = vst [vmem:[#allocation8 + $0xc8] sm:$0xff] %v748_v56  ;;  %v695_v58 = vadd.f32 %v1242_v16, %v694_v57  ;;  %v696_v59 = vpop.f32.mrb[45].mxu1 }
 0x272   :  { %v749_v60 = vmax.f32 %v695_v58, 0.0 }
 0x273   :  { %v699_v61 = vpop.f32.mrb[46].mxu1 }
 0x274   :  { %781 = vst [vmem:[#allocation8 + $0xd0] sm:$0xff] %v749_v60  ;;  %v700_v62 = vadd.f32 %v1242_v16, %v699_v61  ;;  %v701_v53 = vpop.f32.mrb[47].mxu1 }
 0x276   :  { %v750_v63 = vmax.f32 %v700_v62, 0.0 }
 0x277   :  { %v704_v1 = vpop.f32.mrb[48].mxu1 }
 0x278   :  { %782 = vst [vmem:[#allocation8 + $0xd8] sm:$0xff] %v750_v63  ;;  %v705_v2 = vadd.f32 %v1242_v16, %v704_v1  ;;  %v706_v3 = vpop.f32.mrb[49].mxu1 }
 0x27a   :  { %v751_v4 = vmax.f32 %v705_v2, 0.0 }
 0x27b   :  { %v709_v5 = vpop.f32.mrb[50].mxu1 }
 0x27c   :  { %783 = vst [vmem:[#allocation8 + $0xe0] sm:$0xff] %v751_v4  ;;  %v710_v6 = vadd.f32 %v1242_v16, %v709_v5  ;;  %v711_v7 = vpop.f32.mrb[51].mxu1 }
 0x27e   :  { %v752_v8 = vmax.f32 %v710_v6, 0.0 }
 0x27f   :  { %v714_v11 = vpop.f32.mrb[52].mxu1 }
 0x280   :  { %784 = vst [vmem:[#allocation8 + $0xe8] sm:$0xff] %v752_v8  ;;  %v715_v12 = vadd.f32 %v1242_v16, %v714_v11  ;;  %v716_v13 = vpop.f32.mrb[53].mxu1 }
 0x282   :  { %v753_v0 = vmax.f32 %v715_v12, 0.0 }
 0x283   :  { %v719_v14 = vpop.f32.mrb[54].mxu1 }
 0x284   :  { %785 = vst [vmem:[#allocation8 + $0xf0] sm:$0xff] %v753_v0  ;;  %v720_v15 = vadd.f32 %v1242_v16, %v719_v14  ;;  %v721_v17 = vpop.f32.mrb[55].mxu1 }
 0x286   :  { %v754_v18 = vmax.f32 %v720_v15, 0.0 }
 0x288   :  { %786 = vst [vmem:[#allocation8 + $0xf8] sm:$0xff] %v754_v18 }
 0x289   :  { %1005 = shalt.err (!%p1002_p0)
}
 0x28a   :  { %s1006_s12 = scalar_lea.hbm %s1296_s5, 4096 }
 0x28b   :  { %p1007_p1 = scmp.ne.s32.totalorder %s1296_s5, %s1006_s12  ;;  %p1010_p2 = scmp.lt.u32.totalorder %s1006_s12, %s1296_s5 }
 0x28d   :  { %p1012_p3 = pnand %p1010_p2, %p1007_p1 }
 0x28f   :  { %1015 = shalt.err (!%p1012_p3)
}
 0x290   :  { %798 = dma.vmem_to_hbm [thread:$0]  %s793_s8, 4096, %s1296_s5, [#allocation4], %s1026_s1, %s1026_s1, %s1027_s17  }
 0x291   :  { %1020 = dma.done.wait [#allocation4], 4096  }
 0x292   :  { %1021 = vsyncadd [#allocation4], 4294963200 }
 0x293   :  { %802 = vsyncpa [#allocation3], 1 }
 0x294   :  { %803 = vsyncpa [#allocation6], 1 }
 0x295   :  { %804 = vsyncpa [#allocation4], 1 }

// kernel: tpu_custom_call.1
= control target key start
LH: loop header
LB: loop body
LE: loop exit
PB: predicated region body
PF: predicated region fallthrough
CT: control target
= control target key end

     0   :  { %10 = vsyncpa [#allocation3], 0  ;;  %s1291_s0 = inlined_call_operand.hbm [shape: f32[256,128], index: 0, kind: input, shape index: {}]   ;;  %s1292_s1 = inlined_call_operand.hbm [shape: f32[128,256], index: 1, kind: input, shape index: {}]   ;;  %s1293_s2 = inlined_call_operand.vmem [shape: f32[1,256], index: 2, kind: input, shape index: {}]   ;;  %s1294_s3 = inlined_call_operand.hbm [shape: f32[256,128], index: 3, kind: input, shape index: {}]   ;;  %s1295_s4 = inlined_call_operand.vmem [shape: f32[1,128], index: 4, kind: input, shape index: {}]   ;;  %s1296_s5 = inlined_call_operand.hbm [shape: f32[256,128], index: 5, kind: output, shape index: {}]  }
   0x1   :  { %11 = vsyncpa [#allocation6], 0 }
   0x2   :  { %12 = vsyncpa [#allocation4], 0  ;;  %s1022_s18 = smov [#allocation5]   ;;  %s928_s22 = scalar_lea.hbm %s1292_s1, 4096 }
   0x3   :  { %s30_s19 = sshll.u32 %s1022_s18, 4  ;;  %p929_p0 = scmp.ne.s32.totalorder %s1292_s1, %s928_s22  ;;  %s31_s19 = int_to_ptr.vmem [resolvable:$true] %s30_s19 }
   0x4   :  { %p932_p1 = scmp.lt.u32.totalorder %s928_s22, %s1292_s1 }
   0x6   :  { %p934_p2 = pnand %p932_p1, %p929_p0 }
   0x8   :  { %937 = shalt.err (!%p934_p2)
}
   0x9   :  { %s938_s27 = scalar_lea.vmem %s31_s19, 4096  ;;  %p943_p4 = scmp.lt.s32.totalorder %s31_s19, %s31_s19 }
   0xa   :  { %p939_p3 = scmp.ne.s32.totalorder %s31_s19, %s938_s27  ;;  %p944_p5 = scmp.lt.s32.totalorder %s938_s27, %s938_s27 }
   0xc   :  { %p945_p6 = por %p944_p5, %p943_p4 }
   0xe   :  { %p946_p7 = pnand %p945_p6, %p939_p3 }
  0x10   :  { %949 = shalt.err (!%p946_p7)
}
  0x11   :  { %s1023_s28 = smov 256   ;;  %s1024_s29 = smov 16  }
  0x12   :  { %36 = dma.hbm_to_vmem [thread:$0]  %s1292_s1, 4096, %s31_s19, [#allocation6], %s1023_s28, %s1023_s28, %s1024_s29  }
  0x13   :  { %s1025_s7 = smov [#allocation2]   ;;  %s950_s11 = scalar_lea.hbm %s1291_s0, 4096 }
  0x14   :  { %s18_s8 = sshll.u32 %s1025_s7, 4  ;;  %p951_p8 = scmp.ne.s32.totalorder %s1291_s0, %s950_s11  ;;  %s19_s8 = int_to_ptr.vmem [resolvable:$true] %s18_s8 }
  0x15   :  { %p954_p9 = scmp.lt.u32.totalorder %s950_s11, %s1291_s0 }
  0x17   :  { %p956_p10 = pnand %p954_p9, %p951_p8 }
  0x19   :  { %959 = shalt.err (!%p956_p10)
}
  0x1a   :  { %s960_s16 = scalar_lea.vmem %s19_s8, 4096  ;;  %p965_p12 = scmp.lt.s32.totalorder %s19_s8, %s19_s8 }
  0x1b   :  { %p961_p11 = scmp.ne.s32.totalorder %s19_s8, %s960_s16  ;;  %p966_p13 = scmp.lt.s32.totalorder %s960_s16, %s960_s16 }
  0x1d   :  { %p967_p0 = por %p966_p13, %p965_p12 }
  0x1f   :  { %p968_p1 = pnand %p967_p0, %p961_p11 }
  0x21   :  { %971 = shalt.err (!%p968_p1)
}
  0x22   :  { %s1026_s1 = smov 128   ;;  %s1027_s17 = smov 8  }
  0x23   :  { %24 = dma.hbm_to_vmem [thread:$0]  %s1291_s0, 4096, %s19_s8, [#allocation3], %s1026_s1, %s1026_s1, %s1027_s17  }
  0x24   :  { %s1028_s20 = smov [#allocation7]   ;;  %s972_s24 = scalar_lea.hbm %s1294_s3, 4096 }
  0x25   :  { %s44_s21 = sshll.u32 %s1028_s20, 4  ;;  %p973_p2 = scmp.ne.s32.totalorder %s1294_s3, %s972_s24  ;;  %s45_s21 = int_to_ptr.vmem [resolvable:$true] %s44_s21 }
  0x26   :  { %p976_p3 = scmp.lt.u32.totalorder %s972_s24, %s1294_s3 }
  0x28   :  { %p978_p4 = pnand %p976_p3, %p973_p2 }
  0x2a   :  { %981 = shalt.err (!%p978_p4)
}
  0x2b   :  { %s982_s29 = scalar_lea.vmem %s45_s21, 4096  ;;  %p987_p6 = scmp.lt.s32.totalorder %s45_s21, %s45_s21 }
  0x2c   :  { %p983_p5 = scmp.ne.s32.totalorder %s45_s21, %s982_s29  ;;  %p988_p7 = scmp.lt.s32.totalorder %s982_s29, %s982_s29 }
  0x2e   :  { %p989_p8 = por %p988_p7, %p987_p6 }
  0x30   :  { %p990_p9 = pnand %p989_p8, %p983_p5 }
  0x32   :  { %993 = shalt.err (!%p990_p9)
}
  0x33   :  { %50 = dma.hbm_to_vmem [thread:$0]  %s1294_s3, 4096, %s45_s21, [#allocation6], %s1026_s1, %s1026_s1, %s1027_s17  }
  0x34   :  { %1016 = dma.done.wait [#allocation3], 4096  }
  0x35   :  { %1017 = vsyncadd [#allocation3], 4294963200 }
  0x36   :  { %1018 = dma.done.wait [#allocation6], 8192  }
  0x37   :  { %1019 = vsyncadd [#allocation6], 4294959104  ;;  %v1029_v0 = vmov 0.0   ;;  %v95_v1 = vld [vmem:[#allocation5 + $0x8] sm:$0xff]  ;;  %v97_v2 = vld [vmem:[#allocation5 + $0x18] sm:$0xff]  ;;  %v1030_v53 = vmov 0.0|0.0  }
  0x38   :  { %202 = vmatprep.mubr.f32.mxu0 %v1029_v0  ;;  %v94_v3 = vld [vmem:[#allocation5] sm:$0xff]  ;;  %v806_v4 = vpack.c.bf16 %v97_v2, %v95_v1  ;;  %v96_v5 = vld [vmem:[#allocation5 + $0x10] sm:$0xff]  ;;  %v99_v6 = vld [vmem:[#allocation5 + $0x28] sm:$0xff]  ;;  %886 = vmatprep.subr.bf16.mxu1 %v1030_v53 }
  0x39   :  { %v101_v7 = vld [vmem:[#allocation5 + $0x38] sm:$0xff]  ;;  %v808_v8 = vpack.c.bf16 %v96_v5, %v94_v3  ;;  %v98_v10 = vld [vmem:[#allocation5 + $0x20] sm:$0xff]  ;;  %v100_v11 = vld [vmem:[#allocation5 + $0x30] sm:$0xff] }
  0x3a   :  { %v810_v9 = vpack.c.bf16 %v101_v7, %v99_v6  ;;  %v103_v12 = vld [vmem:[#allocation5 + $0x48] sm:$0xff]  ;;  %807 = vmatprep.subr.bf16.mxu0 %v806_v4  ;;  %v105_v13 = vld [vmem:[#allocation5 + $0x58] sm:$0xff]  ;;  %v812_v14 = vpack.c.bf16 %v100_v11, %v98_v10  ;;  %v102_v16 = vld [vmem:[#allocation5 + $0x40] sm:$0xff] }
  0x3b   :  { %809 = vmatpush1.bf16.msra.mxu0 %v808_v8  ;;  %v814_v15 = vpack.c.bf16 %v105_v13, %v103_v12  ;;  %v104_v17 = vld [vmem:[#allocation5 + $0x50] sm:$0xff]  ;;  %v107_v18 = vld [vmem:[#allocation5 + $0x68] sm:$0xff]  ;;  %v109_v19 = vld [vmem:[#allocation5 + $0x78] sm:$0xff] }
  0x3c   :  { %811 = vmatprep.subr.bf16.mxu0 %v810_v9  ;;  %v816_v20 = vpack.c.bf16 %v104_v17, %v102_v16  ;;  %v818_v21 = vpack.c.bf16 %v109_v19, %v107_v18  ;;  %v106_v22 = vld [vmem:[#allocation5 + $0x60] sm:$0xff]  ;;  %v108_v23 = vld [vmem:[#allocation5 + $0x70] sm:$0xff]  ;;  %v111_v24 = vld [vmem:[#allocation5 + $0x88] sm:$0xff] }
  0x3d   :  { %v113_v25 = vld [vmem:[#allocation5 + $0x98] sm:$0xff]  ;;  %v820_v26 = vpack.c.bf16 %v108_v23, %v106_v22  ;;  %v110_v28 = vld [vmem:[#allocation5 + $0x80] sm:$0xff]  ;;  %v112_v29 = vld [vmem:[#allocation5 + $0x90] sm:$0xff] }
  0x3e   :  { %v822_v27 = vpack.c.bf16 %v113_v25, %v111_v24  ;;  %v115_v30 = vld [vmem:[#allocation5 + $0xa8] sm:$0xff]  ;;  %v117_v31 = vld [vmem:[#allocation5 + $0xb8] sm:$0xff]  ;;  %v824_v32 = vpack.c.bf16 %v112_v29, %v110_v28  ;;  %v114_v34 = vld [vmem:[#allocation5 + $0xa0] sm:$0xff] }
  0x3f   :  { %813 = vmatpush1.bf16.msra.mxu0 %v812_v14  ;;  %v826_v33 = vpack.c.bf16 %v117_v31, %v115_v30  ;;  %v116_v35 = vld [vmem:[#allocation5 + $0xb0] sm:$0xff]  ;;  %v119_v36 = vld [vmem:[#allocation5 + $0xc8] sm:$0xff]  ;;  %v121_v37 = vld [vmem:[#allocation5 + $0xd8] sm:$0xff] }
  0x40   :  { %815 = vmatprep.subr.bf16.mxu0 %v814_v15  ;;  %v828_v38 = vpack.c.bf16 %v116_v35, %v114_v34  ;;  %v830_v39 = vpack.c.bf16 %v121_v37, %v119_v36  ;;  %v118_v40 = vld [vmem:[#allocation5 + $0xc0] sm:$0xff]  ;;  %v120_v41 = vld [vmem:[#allocation5 + $0xd0] sm:$0xff]  ;;  %v123_v42 = vld [vmem:[#allocation5 + $0xe8] sm:$0xff] }
  0x41   :  { %v125_v43 = vld [vmem:[#allocation5 + $0xf8] sm:$0xff]  ;;  %v832_v44 = vpack.c.bf16 %v120_v41, %v118_v40  ;;  %v122_v46 = vld [vmem:[#allocation5 + $0xe0] sm:$0xff]  ;;  %v124_v47 = vld [vmem:[#allocation5 + $0xf0] sm:$0xff] }
  0x42   :  { %v834_v45 = vpack.c.bf16 %v125_v43, %v123_v42  ;;  %v836_v48 = vpack.c.bf16 %v124_v47, %v122_v46  ;;  %v459_v49 = vld [vmem:[#allocation7] sm:$0xff]  ;;  %v460_v50 = vld [vmem:[#allocation7 + $0x8] sm:$0xff]  ;;  %v461_v54 = vld [vmem:[#allocation7 + $0x10] sm:$0xff] }
  0x43   :  { %817 = vmatpush1.bf16.msra.mxu0 %v816_v20  ;;  %v62_v51 = vld [vmem:[#allocation2] sm:$0xff]  ;;  %v839_v52 = vpack.c.bf16 %v460_v50, %v459_v49  ;;  %v462_v55 = vld [vmem:[#allocation7 + $0x18] sm:$0xff]  ;;  %v63_v56 = vld [vmem:[#allocation2 + $0x8] sm:$0xff] }
  0x44   :  { %819 = vmatprep.subr.bf16.mxu0 %v818_v21  ;;  %v842_v57 = vpack.c.bf16 %v462_v55, %v461_v54  ;;  %v463_v58 = vld [vmem:[#allocation7 + $0x20] sm:$0xff]  ;;  %v464_v59 = vld [vmem:[#allocation7 + $0x28] sm:$0xff]  ;;  %v64_v60 = vld [vmem:[#allocation2 + $0x10] sm:$0xff] }
  0x45   :  { %902 = vmatpush1.bf16.msra.mxu1 %v839_v52  ;;  %v845_v61 = vpack.c.bf16 %v464_v59, %v463_v58  ;;  %v465_v62 = vld [vmem:[#allocation7 + $0x30] sm:$0xff]  ;;  %v466_v63 = vld [vmem:[#allocation7 + $0x38] sm:$0xff]  ;;  %v467_v3 = vld [vmem:[#allocation7 + $0x40] sm:$0xff] }
  0x46   :  { %887 = vmatprep.subr.bf16.mxu1 %v1030_v53  ;;  %v65_v1 = vld [vmem:[#allocation2 + $0x18] sm:$0xff]  ;;  %v848_v2 = vpack.c.bf16 %v466_v63, %v465_v62  ;;  %v468_v4 = vld [vmem:[#allocation7 + $0x48] sm:$0xff]  ;;  %v66_v5 = vld [vmem:[#allocation2 + $0x20] sm:$0xff] }
  0x47   :  { %821 = vmatpush1.bf16.msra.mxu0 %v820_v26  ;;  %v851_v6 = vpack.c.bf16 %v468_v4, %v467_v3  ;;  %v469_v7 = vld [vmem:[#allocation7 + $0x50] sm:$0xff]  ;;  %v470_v8 = vld [vmem:[#allocation7 + $0x58] sm:$0xff]  ;;  %v67_v9 = vld [vmem:[#allocation2 + $0x28] sm:$0xff]  ;;  %v128_v4 = vlaneseq }
  0x48   :  { %823 = vmatprep.subr.bf16.mxu0 %v822_v27  ;;  %v854_v10 = vpack.c.bf16 %v470_v8, %v469_v7  ;;  %v471_v11 = vld [vmem:[#allocation7 + $0x60] sm:$0xff]  ;;  %v472_v12 = vld [vmem:[#allocation7 + $0x68] sm:$0xff]  ;;  %v68_v13 = vld [vmem:[#allocation2 + $0x30] sm:$0xff] }
  0x49   :  { %903 = vmatpush1.bf16.msra.mxu1 %v842_v57  ;;  %v857_v14 = vpack.c.bf16 %v472_v12, %v471_v11  ;;  %v473_v15 = vld [vmem:[#allocation7 + $0x70] sm:$0xff]  ;;  %v474_v16 = vld [vmem:[#allocation7 + $0x78] sm:$0xff]  ;;  %v475_v19 = vld [vmem:[#allocation7 + $0x80] sm:$0xff] }
  0x4a   :  { %888 = vmatprep.subr.bf16.mxu1 %v1030_v53  ;;  %v69_v17 = vld [vmem:[#allocation2 + $0x38] sm:$0xff]  ;;  %v860_v18 = vpack.c.bf16 %v474_v16, %v473_v15  ;;  %v476_v20 = vld [vmem:[#allocation7 + $0x88] sm:$0xff]  ;;  %v70_v21 = vld [vmem:[#allocation2 + $0x40] sm:$0xff] }
  0x4b   :  { %825 = vmatpush1.bf16.msra.mxu0 %v824_v32  ;;  %v863_v22 = vpack.c.bf16 %v476_v20, %v475_v19  ;;  %v477_v23 = vld [vmem:[#allocation7 + $0x90] sm:$0xff]  ;;  %v478_v24 = vld [vmem:[#allocation7 + $0x98] sm:$0xff]  ;;  %v71_v25 = vld [vmem:[#allocation2 + $0x48] sm:$0xff] }
  0x4c   :  { %827 = vmatprep.subr.bf16.mxu0 %v826_v33  ;;  %v866_v26 = vpack.c.bf16 %v478_v24, %v477_v23  ;;  %v479_v27 = vld [vmem:[#allocation7 + $0xa0] sm:$0xff]  ;;  %v480_v28 = vld [vmem:[#allocation7 + $0xa8] sm:$0xff]  ;;  %v72_v29 = vld [vmem:[#allocation2 + $0x50] sm:$0xff] }
  0x4d   :  { %904 = vmatpush1.bf16.msra.mxu1 %v845_v61  ;;  %v869_v30 = vpack.c.bf16 %v480_v28, %v479_v27  ;;  %v481_v31 = vld [vmem:[#allocation7 + $0xb0] sm:$0xff]  ;;  %v482_v32 = vld [vmem:[#allocation7 + $0xb8] sm:$0xff]  ;;  %v483_v35 = vld [vmem:[#allocation7 + $0xc0] sm:$0xff] }
  0x4e   :  { %889 = vmatprep.subr.bf16.mxu1 %v1030_v53  ;;  %v73_v33 = vld [vmem:[#allocation2 + $0x58] sm:$0xff]  ;;  %v872_v34 = vpack.c.bf16 %v482_v32, %v481_v31  ;;  %v484_v36 = vld [vmem:[#allocation7 + $0xc8] sm:$0xff]  ;;  %v74_v37 = vld [vmem:[#allocation2 + $0x60] sm:$0xff] }
  0x4f   :  { %829 = vmatpush1.bf16.msra.mxu0 %v828_v38  ;;  %v875_v38 = vpack.c.bf16 %v484_v36, %v483_v35  ;;  %v486_v40 = vld [vmem:[#allocation7 + $0xd8] sm:$0xff]  ;;  %v75_v41 = vld [vmem:[#allocation2 + $0x68] sm:$0xff]  ;;  %v76_v43 = vld [vmem:[#allocation2 + $0x70] sm:$0xff] }
  0x50   :  { %831 = vmatprep.subr.bf16.mxu0 %v830_v39  ;;  %v485_v39 = vld [vmem:[#allocation7 + $0xd0] sm:$0xff]  ;;  %v79_v46 = vld [vmem:[#allocation2 + $0x88] sm:$0xff]  ;;  %v82_v49 = vld [vmem:[#allocation2 + $0xa0] sm:$0xff] }
  0x51   :  { %905 = vmatpush1.bf16.msra.mxu1 %v848_v2  ;;  %v878_v42 = vpack.c.bf16 %v486_v40, %v485_v39  ;;  %v80_v47 = vld [vmem:[#allocation2 + $0x90] sm:$0xff]  ;;  %v487_v50 = vld [vmem:[#allocation7 + $0xe0] sm:$0xff]  ;;  %v85_v59 = vld [vmem:[#allocation2 + $0xb8] sm:$0xff] }
  0x52   :  { %890 = vmatprep.subr.bf16.mxu1 %v1030_v53  ;;  %v489_v55 = vld [vmem:[#allocation7 + $0xf0] sm:$0xff]  ;;  %v90_v63 = vld [vmem:[#allocation2 + $0xe0] sm:$0xff]  ;;  %v93_v3 = vld [vmem:[#allocation2 + $0xf8] sm:$0xff] }
  0x53   :  { %833 = vmatpush1.bf16.msra.mxu0 %v832_v44  ;;  %v77_v44 = vld [vmem:[#allocation2 + $0x78] sm:$0xff]  ;;  %v88_v62 = vld [vmem:[#allocation2 + $0xd0] sm:$0xff]  ;;  %v126_v7 = vld [vmem:[%s1293_s2] sm:$0x3] }
  0x54   :  { %835 = vmatprep.subr.bf16.mxu0 %v834_v45  ;;  %v78_v45 = vld [vmem:[#allocation2 + $0x80] sm:$0xff] }
  0x55   :  { %906 = vmatpush1.bf16.msra.mxu1 %v851_v6 }
  0x56   :  { %891 = vmatprep.subr.bf16.mxu1 %v1030_v53 }
  0x57   :  { %837 = vmatpush1.bf16.msra.mxu0 %v836_v48  ;;  %v81_v48 = vld [vmem:[#allocation2 + $0x98] sm:$0xff] }
  0x58   :  { %838 = vmatprep.subr.bf16.mxu0 %v1030_v53 }
  0x59   :  { %907 = vmatpush1.bf16.msra.mxu1 %v854_v10 }
  0x5a   :  { %203 = vmatmul.mubr.f32.vlgmr.msra.gmra.mrb[0].mxu0 %v62_v51  ;;  %892 = vmatprep.subr.bf16.mxu1 %v1030_v53  ;;  %v488_v51 = vld [vmem:[#allocation7 + $0xe8] sm:$0xff] }
  0x5b   :  { %208 = vmatprep.mubr.f32.mxu0 %v1029_v0  ;;  %840 = vmatpush1.bf16.msra.mxu0 %v839_v52  ;;  %v83_v52 = vld [vmem:[#allocation2 + $0xa8] sm:$0xff]  ;;  %v881_v54 = vpack.c.bf16 %v488_v51, %v487_v50 }
  0x5c   :  { %841 = vmatprep.subr.bf16.mxu0 %v1030_v53 }
  0x5d   :  { %908 = vmatpush1.bf16.msra.mxu1 %v857_v14 }
  0x5e   :  { %209 = vmatmul.mubr.f32.gmra.mrb[2].mxu0 %v63_v56  ;;  %893 = vmatprep.subr.bf16.mxu1 %v1030_v53  ;;  %v490_v56 = vld [vmem:[#allocation7 + $0xf8] sm:$0xff] }
  0x5f   :  { %214 = vmatprep.mubr.f32.mxu0 %v1029_v0  ;;  %843 = vmatpush1.bf16.msra.mxu0 %v842_v57  ;;  %v84_v57 = vld [vmem:[#allocation2 + $0xb0] sm:$0xff]  ;;  %v884_v58 = vpack.c.bf16 %v490_v56, %v489_v55 }
  0x60   :  { %844 = vmatprep.subr.bf16.mxu0 %v1030_v53 }
  0x61   :  { %909 = vmatpush1.bf16.msra.mxu1 %v860_v18 }
  0x62   :  { %215 = vmatmul.mubr.f32.gmra.mrb[4].mxu0 %v64_v60  ;;  %894 = vmatprep.subr.bf16.mxu1 %v1030_v53  ;;  %v86_v60 = vld [vmem:[#allocation2 + $0xc0] sm:$0xff] }
  0x63   :  { %220 = vmatprep.mubr.f32.mxu0 %v1029_v0  ;;  %846 = vmatpush1.bf16.msra.mxu0 %v845_v61  ;;  %v87_v61 = vld [vmem:[#allocation2 + $0xc8] sm:$0xff] }
  0x64   :  { %847 = vmatprep.subr.bf16.mxu0 %v1030_v53 }
  0x65   :  { %910 = vmatpush1.bf16.msra.mxu1 %v863_v22 }
  0x66   :  { %221 = vmatmul.mubr.f32.gmra.mrb[6].mxu0 %v65_v1  ;;  %895 = vmatprep.subr.bf16.mxu1 %v1030_v53  ;;  %v91_v1 = vld [vmem:[#allocation2 + $0xe8] sm:$0xff] }
  0x67   :  { %226 = vmatprep.mubr.f32.mxu0 %v1029_v0  ;;  %849 = vmatpush1.bf16.msra.mxu0 %v848_v2  ;;  %v92_v2 = vld [vmem:[#allocation2 + $0xf0] sm:$0xff] }
  0x68   :  { %850 = vmatprep.subr.bf16.mxu0 %v1030_v53 }
  0x69   :  { %911 = vmatpush1.bf16.msra.mxu1 %v866_v26 }
  0x6a   :  { %227 = vmatmul.mubr.f32.gmra.mrb[8].mxu0 %v66_v5  ;;  %896 = vmatprep.subr.bf16.mxu1 %v1030_v53  ;;  %v129_v5 = vshrl.u32 %v128_v4, 7 }
  0x6b   :  { %232 = vmatprep.mubr.f32.mxu0 %v1029_v0  ;;  %852 = vmatpush1.bf16.msra.mxu0 %v851_v6 }
  0x6c   :  { %853 = vmatprep.subr.bf16.mxu0 %v1030_v53  ;;  %v130_v6 = vsub.s32 0, %v129_v5  ;;  %v134_v8 = vsub.s32 1, %v129_v5 }
  0x6d   :  { %912 = vmatpush1.bf16.msra.mxu1 %v869_v30 }
  0x6e   :  { %233 = vmatmul.mubr.f32.gmra.mrb[10].mxu0 %v67_v9  ;;  %897 = vmatprep.subr.bf16.mxu1 %v1030_v53  ;;  %v1171_v9 = vrot.slane %v126_v7, %v130_v6 }
  0x6f   :  { %238 = vmatprep.mubr.f32.mxu0 %v1029_v0  ;;  %855 = vmatpush1.bf16.msra.mxu0 %v854_v10  ;;  %v1173_v10 = vrot.slane %v126_v7, %v134_v8 }
  0x70   :  { %856 = vmatprep.subr.bf16.mxu0 %v1030_v53 }
  0x71   :  { %913 = vmatpush1.bf16.msra.mxu1 %v872_v34 }
  0x72   :  { %239 = vmatmul.mubr.f32.gmra.mrb[12].mxu0 %v68_v13  ;;  %898 = vmatprep.subr.bf16.mxu1 %v1030_v53 }
  0x73   :  { %244 = vmatprep.mubr.f32.mxu0 %v1029_v0  ;;  %858 = vmatpush1.bf16.msra.mxu0 %v857_v14 }
  0x74   :  { %859 = vmatprep.subr.bf16.mxu0 %v1030_v53 }
  0x75   :  { %914 = vmatpush1.bf16.msra.mxu1 %v875_v38 }
  0x76   :  { %245 = vmatmul.mubr.f32.gmra.mrb[14].mxu0 %v69_v17  ;;  %899 = vmatprep.subr.bf16.mxu1 %v1030_v53 }
  0x77   :  { %250 = vmatprep.mubr.f32.mxu0 %v1029_v0  ;;  %861 = vmatpush1.bf16.msra.mxu0 %v860_v18 }
  0x78   :  { %862 = vmatprep.subr.bf16.mxu0 %v1030_v53 }
  0x79   :  { %915 = vmatpush1.bf16.msra.mxu1 %v878_v42 }
  0x7a   :  { %251 = vmatmul.mubr.f32.gmra.mrb[16].mxu0 %v70_v21  ;;  %900 = vmatprep.subr.bf16.mxu1 %v1030_v53 }
  0x7b   :  { %256 = vmatprep.mubr.f32.mxu0 %v1029_v0  ;;  %864 = vmatpush1.bf16.msra.mxu0 %v863_v22 }
  0x7c   :  { %865 = vmatprep.subr.bf16.mxu0 %v1030_v53 }
  0x7d   :  { %916 = vmatpush1.bf16.msra.mxu1 %v881_v54 }
  0x7e   :  { %257 = vmatmul.mubr.f32.gmra.mrb[18].mxu0 %v71_v25  ;;  %901 = vmatprep.subr.bf16.mxu1 %v1030_v53 }
  0x7f   :  { %262 = vmatprep.mubr.f32.mxu0 %v1029_v0  ;;  %867 = vmatpush1.bf16.msra.mxu0 %v866_v26 }
  0x80   :  { %868 = vmatprep.subr.bf16.mxu0 %v1030_v53 }
  0x81   :  { %917 = vmatpush1.bf16.msra.mxu1 %v884_v58 }
  0x82   :  { %263 = vmatmul.mubr.f32.gmra.mrb[20].mxu0 %v72_v29 }
  0x83   :  { %268 = vmatprep.mubr.f32.mxu0 %v1029_v0  ;;  %870 = vmatpush1.bf16.msra.mxu0 %v869_v30 }
  0x84   :  { %871 = vmatprep.subr.bf16.mxu0 %v1030_v53 }
  0x86   :  { %269 = vmatmul.mubr.f32.gmra.mrb[22].mxu0 %v73_v33 }
  0x87   :  { %274 = vmatprep.mubr.f32.mxu0 %v1029_v0  ;;  %873 = vmatpush1.bf16.msra.mxu0 %v872_v34 }
  0x88   :  { %874 = vmatprep.subr.bf16.mxu0 %v1030_v53 }
  0x8a   :  { %275 = vmatmul.mubr.f32.gmra.mrb[24].mxu0 %v74_v37 }
  0x8b   :  { %280 = vmatprep.mubr.f32.mxu0 %v1029_v0  ;;  %876 = vmatpush1.bf16.msra.mxu0 %v875_v38 }
  0x8c   :  { %877 = vmatprep.subr.bf16.mxu0 %v1030_v53 }
  0x8e   :  { %281 = vmatmul.mubr.f32.gmra.mrb[26].mxu0 %v75_v41 }
  0x8f   :  { %286 = vmatprep.mubr.f32.mxu0 %v1029_v0  ;;  %879 = vmatpush1.bf16.msra.mxu0 %v878_v42 }
  0x90   :  { %880 = vmatprep.subr.bf16.mxu0 %v1030_v53 }
  0x92   :  { %287 = vmatmul.mubr.f32.gmra.mrb[28].mxu0 %v76_v43 }
  0x93   :  { %292 = vmatprep.mubr.f32.mxu0 %v1029_v0  ;;  %882 = vmatpush1.bf16.msra.mxu0 %v881_v54 }
  0x94   :  { %883 = vmatprep.subr.bf16.mxu0 %v1030_v53  ;;  %v89_v53 = vld [vmem:[#allocation2 + $0xd8] sm:$0xff] }
  0x96   :  { %293 = vmatmul.mubr.f32.gmra.mrb[30].mxu0 %v77_v44 }
  0x97   :  { %298 = vmatprep.mubr.f32.mxu0 %v1029_v0  ;;  %885 = vmatpush1.bf16.msra.mxu0 %v884_v58 }
  0x9a   :  { %299 = vmatmul.mubr.f32.gmra.mrb[32].mxu0 %v78_v45 }
  0x9b   :  { %304 = vmatprep.mubr.f32.mxu0 %v1029_v0 }
  0x9e   :  { %305 = vmatmul.mubr.f32.gmra.mrb[34].mxu0 %v79_v46 }
  0x9f   :  { %310 = vmatprep.mubr.f32.mxu0 %v1029_v0 }
  0xa2   :  { %311 = vmatmul.mubr.f32.gmra.mrb[36].mxu0 %v80_v47 }
  0xa3   :  { %316 = vmatprep.mubr.f32.mxu0 %v1029_v0 }
  0xa6   :  { %317 = vmatmul.mubr.f32.gmra.mrb[38].mxu0 %v81_v48 }
  0xa7   :  { %322 = vmatprep.mubr.f32.mxu0 %v1029_v0 }
  0xaa   :  { %323 = vmatmul.mubr.f32.gmra.mrb[40].mxu0 %v82_v49 }
  0xab   :  { %328 = vmatprep.mubr.f32.mxu0 %v1029_v0 }
  0xae   :  { %329 = vmatmul.mubr.f32.gmra.mrb[42].mxu0 %v83_v52 }
  0xaf   :  { %334 = vmatprep.mubr.f32.mxu0 %v1029_v0 }
  0xb2   :  { %335 = vmatmul.mubr.f32.gmra.mrb[44].mxu0 %v84_v57 }
  0xb3   :  { %340 = vmatprep.mubr.f32.mxu0 %v1029_v0 }
  0xb6   :  { %341 = vmatmul.mubr.f32.gmra.mrb[46].mxu0 %v85_v59 }
  0xb7   :  { %346 = vmatprep.mubr.f32.mxu0 %v1029_v0 }
  0xba   :  { %347 = vmatmul.mubr.f32.gmra.mrb[48].mxu0 %v86_v60 }
  0xbb   :  { %352 = vmatprep.mubr.f32.mxu0 %v1029_v0 }
  0xbe   :  { %353 = vmatmul.mubr.f32.gmra.mrb[50].mxu0 %v87_v61 }
  0xbf   :  { %358 = vmatprep.mubr.f32.mxu0 %v1029_v0 }
  0xc2   :  { %359 = vmatmul.mubr.f32.gmra.mrb[52].mxu0 %v88_v62 }
  0xc3   :  { %364 = vmatprep.mubr.f32.mxu0 %v1029_v0 }
  0xc6   :  { %365 = vmatmul.mubr.f32.gmra.mrb[54].mxu0 %v89_v53 }
  0xc7   :  { %370 = vmatprep.mubr.f32.mxu0 %v1029_v0 }
  0xca   :  { %371 = vmatmul.mubr.f32.gmra.mrb[56].mxu0 %v90_v63 }
  0xcb   :  { %376 = vmatprep.mubr.f32.mxu0 %v1029_v0 }
  0xce   :  { %377 = vmatmul.mubr.f32.gmra.mrb[58].mxu0 %v91_v1 }
  0xcf   :  { %382 = vmatprep.mubr.f32.mxu0 %v1029_v0 }
  0xd2   :  { %383 = vmatmul.mubr.f32.gmra.mrb[60].mxu0 %v92_v2 }
  0xd3   :  { %388 = vmatprep.mubr.f32.mxu0 %v1029_v0 }
  0xd6   :  { %389 = vmatmul.mubr.f32.gmra.mrb[62].mxu0 %v93_v3 }
 0x12d   :  { %v204_v11 = vpop.f32.mrb[0].mxu0 }
 0x12e   :  { %v205_v12 = vadd.f32 %v204_v11, %v1171_v9  ;;  %v206_v13 = vpop.f32.mrb[1].mxu0 }
 0x12f   :  { %v207_v0 = vadd.f32 %v206_v13, %v1173_v10 }
 0x130   :  { %v395_v16 = vmax.f32 %v205_v12, 0.0 }
 0x131   :  { %v396_v14 = vmax.f32 %v207_v0, 0.0  ;;  %v210_v15 = vpop.f32.mrb[2].mxu0 }
 0x132   :  { %v211_v17 = vadd.f32 %v210_v15, %v1171_v9  ;;  %v212_v18 = vpop.f32.mrb[3].mxu0 }
 0x133   :  { %v213_v19 = vadd.f32 %v212_v18, %v1173_v10  ;;  %562 = vmatprep.mubr.f32.mxu0 %v396_v14 }
 0x134   :  { %563 = vmatmul.mubr.f32.vlgmr.msra.gmra.mrb[64].mxu0 %v395_v16  ;;  %v397_v22 = vmax.f32 %v211_v17, 0.0 }
 0x135   :  { %v398_v20 = vmax.f32 %v213_v19, 0.0  ;;  %v216_v21 = vpop.f32.mrb[4].mxu0 }
 0x136   :  { %v217_v23 = vadd.f32 %v216_v21, %v1171_v9  ;;  %v218_v24 = vpop.f32.mrb[5].mxu0 }
 0x137   :  { %v219_v25 = vadd.f32 %v218_v24, %v1173_v10  ;;  %567 = vmatprep.mubr.f32.mxu0 %v398_v20 }
 0x138   :  { %568 = vmatmul.mubr.f32.gmra.mrb[66].mxu0 %v397_v22  ;;  %v399_v28 = vmax.f32 %v217_v23, 0.0 }
 0x139   :  { %v400_v26 = vmax.f32 %v219_v25, 0.0  ;;  %v222_v27 = vpop.f32.mrb[6].mxu0 }
 0x13a   :  { %v223_v29 = vadd.f32 %v222_v27, %v1171_v9  ;;  %v224_v30 = vpop.f32.mrb[7].mxu0 }
 0x13b   :  { %v225_v31 = vadd.f32 %v224_v30, %v1173_v10  ;;  %572 = vmatprep.mubr.f32.mxu0 %v400_v26 }
 0x13c   :  { %573 = vmatmul.mubr.f32.gmra.mrb[68].mxu0 %v399_v28  ;;  %v401_v34 = vmax.f32 %v223_v29, 0.0 }
 0x13d   :  { %v402_v32 = vmax.f32 %v225_v31, 0.0  ;;  %v228_v33 = vpop.f32.mrb[8].mxu0 }
 0x13e   :  { %v229_v35 = vadd.f32 %v228_v33, %v1171_v9  ;;  %v230_v36 = vpop.f32.mrb[9].mxu0 }
 0x13f   :  { %577 = vmatprep.mubr.f32.mxu0 %v402_v32  ;;  %v231_v37 = vadd.f32 %v230_v36, %v1173_v10 }
 0x140   :  { %578 = vmatmul.mubr.f32.gmra.mrb[70].mxu0 %v401_v34  ;;  %v403_v40 = vmax.f32 %v229_v35, 0.0 }
 0x141   :  { %v234_v38 = vpop.f32.mrb[10].mxu0  ;;  %v404_v39 = vmax.f32 %v231_v37, 0.0 }
 0x142   :  { %v235_v41 = vadd.f32 %v234_v38, %v1171_v9  ;;  %v236_v42 = vpop.f32.mrb[11].mxu0 }
 0x143   :  { %v237_v43 = vadd.f32 %v236_v42, %v1173_v10  ;;  %582 = vmatprep.mubr.f32.mxu1 %v404_v39 }
 0x144   :  { %583 = vmatmul.mubr.f32.vlgmr.msra.gmra.mrb[0].mxu1 %v403_v40  ;;  %v405_v46 = vmax.f32 %v235_v41, 0.0 }
 0x145   :  { %v406_v44 = vmax.f32 %v237_v43, 0.0  ;;  %v240_v45 = vpop.f32.mrb[12].mxu0 }
 0x146   :  { %v241_v47 = vadd.f32 %v240_v45, %v1171_v9  ;;  %v242_v48 = vpop.f32.mrb[13].mxu0 }
 0x147   :  { %v243_v49 = vadd.f32 %v242_v48, %v1173_v10  ;;  %587 = vmatprep.mubr.f32.mxu1 %v406_v44 }
 0x148   :  { %588 = vmatmul.mubr.f32.gmra.mrb[2].mxu1 %v405_v46  ;;  %v407_v52 = vmax.f32 %v241_v47, 0.0 }
 0x149   :  { %v408_v50 = vmax.f32 %v243_v49, 0.0  ;;  %v246_v51 = vpop.f32.mrb[14].mxu0 }
 0x14a   :  { %v247_v54 = vadd.f32 %v246_v51, %v1171_v9  ;;  %v248_v55 = vpop.f32.mrb[15].mxu0 }
 0x14b   :  { %v249_v56 = vadd.f32 %v248_v55, %v1173_v10  ;;  %592 = vmatprep.mubr.f32.mxu1 %v408_v50 }
 0x14c   :  { %593 = vmatmul.mubr.f32.gmra.mrb[4].mxu1 %v407_v52  ;;  %v409_v59 = vmax.f32 %v247_v54, 0.0 }
 0x14d   :  { %v410_v57 = vmax.f32 %v249_v56, 0.0  ;;  %v252_v58 = vpop.f32.mrb[16].mxu0 }
 0x14e   :  { %v253_v60 = vadd.f32 %v252_v58, %v1171_v9  ;;  %v254_v61 = vpop.f32.mrb[17].mxu0 }
 0x14f   :  { %v255_v62 = vadd.f32 %v254_v61, %v1173_v10  ;;  %597 = vmatprep.mubr.f32.mxu1 %v410_v57 }
 0x150   :  { %598 = vmatmul.mubr.f32.gmra.mrb[6].mxu1 %v409_v59  ;;  %v411_v1 = vmax.f32 %v253_v60, 0.0 }
 0x151   :  { %v412_v53 = vmax.f32 %v255_v62, 0.0  ;;  %v258_v63 = vpop.f32.mrb[18].mxu0 }
 0x152   :  { %v259_v2 = vadd.f32 %v258_v63, %v1171_v9  ;;  %v260_v3 = vpop.f32.mrb[19].mxu0 }
 0x153   :  { %v261_v4 = vadd.f32 %v260_v3, %v1173_v10  ;;  %602 = vmatprep.mubr.f32.mxu1 %v412_v53 }
 0x154   :  { %603 = vmatmul.mubr.f32.gmra.mrb[8].mxu1 %v411_v1  ;;  %v413_v7 = vmax.f32 %v259_v2, 0.0 }
 0x155   :  { %v414_v5 = vmax.f32 %v261_v4, 0.0  ;;  %v264_v6 = vpop.f32.mrb[20].mxu0 }
 0x156   :  { %v265_v8 = vadd.f32 %v264_v6, %v1171_v9  ;;  %v266_v11 = vpop.f32.mrb[21].mxu0 }
 0x157   :  { %v267_v12 = vadd.f32 %v266_v11, %v1173_v10  ;;  %607 = vmatprep.mubr.f32.mxu1 %v414_v5 }
 0x158   :  { %608 = vmatmul.mubr.f32.gmra.mrb[10].mxu1 %v413_v7  ;;  %v415_v14 = vmax.f32 %v265_v8, 0.0 }
 0x159   :  { %v416_v13 = vmax.f32 %v267_v12, 0.0  ;;  %v270_v0 = vpop.f32.mrb[22].mxu0 }
 0x15a   :  { %v271_v15 = vadd.f32 %v270_v0, %v1171_v9  ;;  %v272_v16 = vpop.f32.mrb[23].mxu0 }
 0x15b   :  { %v273_v17 = vadd.f32 %v272_v16, %v1173_v10  ;;  %612 = vmatprep.mubr.f32.mxu1 %v416_v13 }
 0x15c   :  { %613 = vmatmul.mubr.f32.gmra.mrb[12].mxu1 %v415_v14  ;;  %v417_v20 = vmax.f32 %v271_v15, 0.0 }
 0x15d   :  { %v418_v18 = vmax.f32 %v273_v17, 0.0  ;;  %v276_v19 = vpop.f32.mrb[24].mxu0 }
 0x15e   :  { %v277_v21 = vadd.f32 %v276_v19, %v1171_v9  ;;  %v278_v22 = vpop.f32.mrb[25].mxu0 }
 0x15f   :  { %v279_v23 = vadd.f32 %v278_v22, %v1173_v10  ;;  %617 = vmatprep.mubr.f32.mxu1 %v418_v18 }
 0x160   :  { %618 = vmatmul.mubr.f32.gmra.mrb[14].mxu1 %v417_v20  ;;  %v419_v26 = vmax.f32 %v277_v21, 0.0 }
 0x161   :  { %v420_v24 = vmax.f32 %v279_v23, 0.0  ;;  %v282_v25 = vpop.f32.mrb[26].mxu0 }
 0x162   :  { %v283_v27 = vadd.f32 %v282_v25, %v1171_v9  ;;  %v284_v28 = vpop.f32.mrb[27].mxu0 }
 0x163   :  { %v285_v29 = vadd.f32 %v284_v28, %v1173_v10  ;;  %622 = vmatprep.mubr.f32.mxu1 %v420_v24 }
 0x164   :  { %623 = vmatmul.mubr.f32.gmra.mrb[16].mxu1 %v419_v26  ;;  %v421_v32 = vmax.f32 %v283_v27, 0.0 }
 0x165   :  { %v422_v30 = vmax.f32 %v285_v29, 0.0  ;;  %v288_v31 = vpop.f32.mrb[28].mxu0 }
 0x166   :  { %v289_v33 = vadd.f32 %v288_v31, %v1171_v9  ;;  %v290_v34 = vpop.f32.mrb[29].mxu0 }
 0x167   :  { %v291_v35 = vadd.f32 %v290_v34, %v1173_v10  ;;  %627 = vmatprep.mubr.f32.mxu1 %v422_v30 }
 0x168   :  { %628 = vmatmul.mubr.f32.gmra.mrb[18].mxu1 %v421_v32  ;;  %v423_v38 = vmax.f32 %v289_v33, 0.0 }
 0x169   :  { %v424_v36 = vmax.f32 %v291_v35, 0.0  ;;  %v294_v37 = vpop.f32.mrb[30].mxu0 }
 0x16a   :  { %v295_v39 = vadd.f32 %v294_v37, %v1171_v9  ;;  %v296_v40 = vpop.f32.mrb[31].mxu0 }
 0x16b   :  { %v297_v41 = vadd.f32 %v296_v40, %v1173_v10  ;;  %632 = vmatprep.mubr.f32.mxu1 %v424_v36 }
 0x16c   :  { %633 = vmatmul.mubr.f32.gmra.mrb[20].mxu1 %v423_v38  ;;  %v425_v44 = vmax.f32 %v295_v39, 0.0 }
 0x16d   :  { %v426_v42 = vmax.f32 %v297_v41, 0.0  ;;  %v300_v43 = vpop.f32.mrb[32].mxu0 }
 0x16e   :  { %v301_v45 = vadd.f32 %v300_v43, %v1171_v9  ;;  %v302_v46 = vpop.f32.mrb[33].mxu0 }
 0x16f   :  { %v303_v47 = vadd.f32 %v302_v46, %v1173_v10  ;;  %637 = vmatprep.mubr.f32.mxu1 %v426_v42 }
 0x170   :  { %638 = vmatmul.mubr.f32.gmra.mrb[22].mxu1 %v425_v44  ;;  %v427_v50 = vmax.f32 %v301_v45, 0.0 }
 0x171   :  { %v428_v48 = vmax.f32 %v303_v47, 0.0  ;;  %v306_v49 = vpop.f32.mrb[34].mxu0 }
 0x172   :  { %v307_v51 = vadd.f32 %v306_v49, %v1171_v9  ;;  %v308_v52 = vpop.f32.mrb[35].mxu0 }
 0x173   :  { %v309_v54 = vadd.f32 %v308_v52, %v1173_v10  ;;  %642 = vmatprep.mubr.f32.mxu1 %v428_v48 }
 0x174   :  { %643 = vmatmul.mubr.f32.gmra.mrb[24].mxu1 %v427_v50  ;;  %v429_v57 = vmax.f32 %v307_v51, 0.0 }
 0x175   :  { %v430_v55 = vmax.f32 %v309_v54, 0.0  ;;  %v312_v56 = vpop.f32.mrb[36].mxu0 }
 0x176   :  { %v313_v58 = vadd.f32 %v312_v56, %v1171_v9  ;;  %v314_v59 = vpop.f32.mrb[37].mxu0 }
 0x177   :  { %v315_v60 = vadd.f32 %v314_v59, %v1173_v10  ;;  %647 = vmatprep.mubr.f32.mxu1 %v430_v55 }
 0x178   :  { %648 = vmatmul.mubr.f32.gmra.mrb[26].mxu1 %v429_v57  ;;  %v431_v53 = vmax.f32 %v313_v58, 0.0 }
 0x179   :  { %v432_v61 = vmax.f32 %v315_v60, 0.0  ;;  %v318_v62 = vpop.f32.mrb[38].mxu0 }
 0x17a   :  { %v319_v63 = vadd.f32 %v318_v62, %v1171_v9  ;;  %v320_v1 = vpop.f32.mrb[39].mxu0 }
 0x17b   :  { %v321_v2 = vadd.f32 %v320_v1, %v1173_v10  ;;  %652 = vmatprep.mubr.f32.mxu1 %v432_v61 }
 0x17c   :  { %653 = vmatmul.mubr.f32.gmra.mrb[28].mxu1 %v431_v53  ;;  %v433_v5 = vmax.f32 %v319_v63, 0.0 }
 0x17d   :  { %v434_v3 = vmax.f32 %v321_v2, 0.0  ;;  %v324_v4 = vpop.f32.mrb[40].mxu0 }
 0x17e   :  { %v325_v6 = vadd.f32 %v324_v4, %v1171_v9  ;;  %v326_v7 = vpop.f32.mrb[41].mxu0 }
 0x17f   :  { %v327_v8 = vadd.f32 %v326_v7, %v1173_v10  ;;  %657 = vmatprep.mubr.f32.mxu1 %v434_v3 }
 0x180   :  { %658 = vmatmul.mubr.f32.gmra.mrb[30].mxu1 %v433_v5  ;;  %v435_v13 = vmax.f32 %v325_v6, 0.0 }
 0x181   :  { %v436_v11 = vmax.f32 %v327_v8, 0.0  ;;  %v330_v12 = vpop.f32.mrb[42].mxu0 }
 0x182   :  { %v331_v0 = vadd.f32 %v330_v12, %v1171_v9  ;;  %v332_v14 = vpop.f32.mrb[43].mxu0 }
 0x183   :  { %v333_v15 = vadd.f32 %v332_v14, %v1173_v10  ;;  %662 = vmatprep.mubr.f32.mxu1 %v436_v11 }
 0x184   :  { %663 = vmatmul.mubr.f32.gmra.mrb[32].mxu1 %v435_v13  ;;  %v437_v18 = vmax.f32 %v331_v0, 0.0 }
 0x185   :  { %v438_v16 = vmax.f32 %v333_v15, 0.0  ;;  %v336_v17 = vpop.f32.mrb[44].mxu0 }
 0x186   :  { %v337_v19 = vadd.f32 %v336_v17, %v1171_v9  ;;  %v338_v20 = vpop.f32.mrb[45].mxu0 }
 0x187   :  { %v339_v21 = vadd.f32 %v338_v20, %v1173_v10  ;;  %667 = vmatprep.mubr.f32.mxu1 %v438_v16  ;;  %v1242_v16 = vld [vmem:[%s1295_s4] ss:$0 sm:$0xff]  ;;  %s1031_s4 = smov [#allocation8]  }
 0x188   :  { %668 = vmatmul.mubr.f32.gmra.mrb[34].mxu1 %v437_v18  ;;  %v439_v24 = vmax.f32 %v337_v19, 0.0  ;;  %s792_s8 = sshll.u32 %s1031_s4, 4  ;;  %s793_s8 = int_to_ptr.vmem [resolvable:$true] %s792_s8 }
 0x189   :  { %v440_v22 = vmax.f32 %v339_v21, 0.0  ;;  %v342_v23 = vpop.f32.mrb[46].mxu0  ;;  %s994_s9 = scalar_lea.vmem %s793_s8, 4096  ;;  %p999_p11 = scmp.lt.s32.totalorder %s793_s8, %s793_s8 }
 0x18a   :  { %v343_v25 = vadd.f32 %v342_v23, %v1171_v9  ;;  %v344_v26 = vpop.f32.mrb[47].mxu0  ;;  %p995_p10 = scmp.ne.s32.totalorder %s793_s8, %s994_s9  ;;  %p1000_p12 = scmp.lt.s32.totalorder %s994_s9, %s994_s9 }
 0x18b   :  { %v345_v27 = vadd.f32 %v344_v26, %v1173_v10  ;;  %672 = vmatprep.mubr.f32.mxu1 %v440_v22 }
 0x18c   :  { %673 = vmatmul.mubr.f32.gmra.mrb[36].mxu1 %v439_v24  ;;  %v441_v30 = vmax.f32 %v343_v25, 0.0  ;;  %p1001_p13 = por %p1000_p12, %p999_p11 }
 0x18d   :  { %v442_v28 = vmax.f32 %v345_v27, 0.0  ;;  %v348_v29 = vpop.f32.mrb[48].mxu0 }
 0x18e   :  { %v349_v31 = vadd.f32 %v348_v29, %v1171_v9  ;;  %v350_v32 = vpop.f32.mrb[49].mxu0  ;;  %p1002_p0 = pnand %p1001_p13, %p995_p10 }
 0x18f   :  { %v351_v33 = vadd.f32 %v350_v32, %v1173_v10  ;;  %677 = vmatprep.mubr.f32.mxu1 %v442_v28 }
 0x190   :  { %678 = vmatmul.mubr.f32.gmra.mrb[38].mxu1 %v441_v30  ;;  %v443_v36 = vmax.f32 %v349_v31, 0.0 }
 0x191   :  { %v444_v34 = vmax.f32 %v351_v33, 0.0  ;;  %v354_v35 = vpop.f32.mrb[50].mxu0 }
 0x192   :  { %v355_v37 = vadd.f32 %v354_v35, %v1171_v9  ;;  %v356_v38 = vpop.f32.mrb[51].mxu0 }
 0x193   :  { %v357_v39 = vadd.f32 %v356_v38, %v1173_v10  ;;  %682 = vmatprep.mubr.f32.mxu1 %v444_v34 }
 0x194   :  { %683 = vmatmul.mubr.f32.gmra.mrb[40].mxu1 %v443_v36  ;;  %v445_v42 = vmax.f32 %v355_v37, 0.0 }
 0x195   :  { %v446_v40 = vmax.f32 %v357_v39, 0.0  ;;  %v360_v41 = vpop.f32.mrb[52].mxu0 }
 0x196   :  { %v361_v43 = vadd.f32 %v360_v41, %v1171_v9  ;;  %v362_v44 = vpop.f32.mrb[53].mxu0 }
 0x197   :  { %v363_v45 = vadd.f32 %v362_v44, %v1173_v10  ;;  %687 = vmatprep.mubr.f32.mxu1 %v446_v40 }
 0x198   :  { %688 = vmatmul.mubr.f32.gmra.mrb[42].mxu1 %v445_v42  ;;  %v447_v48 = vmax.f32 %v361_v43, 0.0 }
 0x199   :  { %v448_v46 = vmax.f32 %v363_v45, 0.0  ;;  %v366_v47 = vpop.f32.mrb[54].mxu0 }
 0x19a   :  { %v367_v49 = vadd.f32 %v366_v47, %v1171_v9  ;;  %v368_v50 = vpop.f32.mrb[55].mxu0 }
 0x19b   :  { %v369_v51 = vadd.f32 %v368_v50, %v1173_v10  ;;  %692 = vmatprep.mubr.f32.mxu1 %v448_v46 }
 0x19c   :  { %693 = vmatmul.mubr.f32.gmra.mrb[44].mxu1 %v447_v48  ;;  %v449_v55 = vmax.f32 %v367_v49, 0.0 }
 0x19d   :  { %v450_v52 = vmax.f32 %v369_v51, 0.0  ;;  %v372_v54 = vpop.f32.mrb[56].mxu0 }
 0x19e   :  { %v373_v56 = vadd.f32 %v372_v54, %v1171_v9  ;;  %v374_v57 = vpop.f32.mrb[57].mxu0 }
 0x19f   :  { %v375_v58 = vadd.f32 %v374_v57, %v1173_v10  ;;  %697 = vmatprep.mubr.f32.mxu1 %v450_v52 }
 0x1a0   :  { %698 = vmatmul.mubr.f32.gmra.mrb[46].mxu1 %v449_v55  ;;  %v451_v61 = vmax.f32 %v373_v56, 0.0 }
 0x1a1   :  { %v452_v59 = vmax.f32 %v375_v58, 0.0  ;;  %v378_v60 = vpop.f32.mrb[58].mxu0 }
 0x1a2   :  { %v379_v62 = vadd.f32 %v378_v60, %v1171_v9  ;;  %v380_v53 = vpop.f32.mrb[59].mxu0 }
 0x1a3   :  { %v381_v63 = vadd.f32 %v380_v53, %v1173_v10  ;;  %702 = vmatprep.mubr.f32.mxu1 %v452_v59 }
 0x1a4   :  { %703 = vmatmul.mubr.f32.gmra.mrb[48].mxu1 %v451_v61  ;;  %v453_v3 = vmax.f32 %v379_v62, 0.0 }
 0x1a5   :  { %v454_v1 = vmax.f32 %v381_v63, 0.0  ;;  %v384_v2 = vpop.f32.mrb[60].mxu0 }
 0x1a6   :  { %v385_v4 = vadd.f32 %v384_v2, %v1171_v9  ;;  %v386_v5 = vpop.f32.mrb[61].mxu0 }
 0x1a7   :  { %v387_v6 = vadd.f32 %v386_v5, %v1173_v10  ;;  %707 = vmatprep.mubr.f32.mxu1 %v454_v1 }
 0x1a8   :  { %708 = vmatmul.mubr.f32.gmra.mrb[50].mxu1 %v453_v3  ;;  %v455_v11 = vmax.f32 %v385_v4, 0.0 }
 0x1a9   :  { %v456_v7 = vmax.f32 %v387_v6, 0.0  ;;  %v390_v8 = vpop.f32.mrb[62].mxu0 }
 0x1aa   :  { %v391_v12 = vadd.f32 %v390_v8, %v1171_v9  ;;  %v392_v13 = vpop.f32.mrb[63].mxu0 }
 0x1ab   :  { %v393_v0 = vadd.f32 %v392_v13, %v1173_v10  ;;  %712 = vmatprep.mubr.f32.mxu1 %v456_v7 }
 0x1ac   :  { %713 = vmatmul.mubr.f32.gmra.mrb[52].mxu1 %v455_v11  ;;  %v457_v15 = vmax.f32 %v391_v12, 0.0 }
 0x1ad   :  { %v458_v14 = vmax.f32 %v393_v0, 0.0 }
 0x1af   :  { %717 = vmatprep.mubr.f32.mxu1 %v458_v14 }
 0x1b0   :  { %718 = vmatmul.mubr.f32.gmra.mrb[54].mxu1 %v457_v15 }
 0x207   :  { %v564_v17 = vpop.f32.mrb[64].mxu0 }
 0x208   :  { %v565_v18 = vadd.f32 %v1242_v16, %v564_v17  ;;  %v566_v19 = vpop.f32.mrb[65].mxu0 }
 0x20a   :  { %v723_v20 = vmax.f32 %v565_v18, 0.0 }
 0x20b   :  { %v569_v9 = vpop.f32.mrb[66].mxu0 }
 0x20c   :  { %755 = vst [vmem:[#allocation8] sm:$0xff] %v723_v20  ;;  %v570_v10 = vadd.f32 %v1242_v16, %v569_v9  ;;  %v571_v21 = vpop.f32.mrb[67].mxu0 }
 0x20e   :  { %v724_v22 = vmax.f32 %v570_v10, 0.0 }
 0x20f   :  { %v574_v23 = vpop.f32.mrb[68].mxu0 }
 0x210   :  { %756 = vst [vmem:[#allocation8 + $0x8] sm:$0xff] %v724_v22  ;;  %v575_v24 = vadd.f32 %v1242_v16, %v574_v23  ;;  %v576_v25 = vpop.f32.mrb[69].mxu0 }
 0x212   :  { %v725_v26 = vmax.f32 %v575_v24, 0.0 }
 0x213   :  { %v579_v27 = vpop.f32.mrb[70].mxu0 }
 0x214   :  { %757 = vst [vmem:[#allocation8 + $0x10] sm:$0xff] %v725_v26  ;;  %v580_v28 = vadd.f32 %v1242_v16, %v579_v27  ;;  %v581_v29 = vpop.f32.mrb[71].mxu0 }
 0x216   :  { %v726_v30 = vmax.f32 %v580_v28, 0.0 }
 0x217   :  { %v584_v31 = vpop.f32.mrb[0].mxu1 }
 0x218   :  { %758 = vst [vmem:[#allocation8 + $0x18] sm:$0xff] %v726_v30  ;;  %v585_v32 = vadd.f32 %v1242_v16, %v584_v31  ;;  %v586_v33 = vpop.f32.mrb[1].mxu1 }
 0x21a   :  { %v727_v34 = vmax.f32 %v585_v32, 0.0 }
 0x21b   :  { %v589_v35 = vpop.f32.mrb[2].mxu1 }
 0x21c   :  { %759 = vst [vmem:[#allocation8 + $0x20] sm:$0xff] %v727_v34  ;;  %v590_v36 = vadd.f32 %v1242_v16, %v589_v35  ;;  %v591_v37 = vpop.f32.mrb[3].mxu1 }
 0x21e   :  { %v728_v38 = vmax.f32 %v590_v36, 0.0 }
 0x21f   :  { %v594_v39 = vpop.f32.mrb[4].mxu1 }
 0x220   :  { %760 = vst [vmem:[#allocation8 + $0x28] sm:$0xff] %v728_v38  ;;  %v595_v40 = vadd.f32 %v1242_v16, %v594_v39  ;;  %v596_v41 = vpop.f32.mrb[5].mxu1 }
 0x222   :  { %v729_v42 = vmax.f32 %v595_v40, 0.0 }
 0x223   :  { %v599_v43 = vpop.f32.mrb[6].mxu1 }
 0x224   :  { %761 = vst [vmem:[#allocation8 + $0x30] sm:$0xff] %v729_v42  ;;  %v600_v44 = vadd.f32 %v1242_v16, %v599_v43  ;;  %v601_v45 = vpop.f32.mrb[7].mxu1 }
 0x226   :  { %v730_v46 = vmax.f32 %v600_v44, 0.0 }
 0x227   :  { %v604_v47 = vpop.f32.mrb[8].mxu1 }
 0x228   :  { %762 = vst [vmem:[#allocation8 + $0x38] sm:$0xff] %v730_v46  ;;  %v605_v48 = vadd.f32 %v1242_v16, %v604_v47  ;;  %v606_v49 = vpop.f32.mrb[9].mxu1 }
 0x22a   :  { %v731_v50 = vmax.f32 %v605_v48, 0.0 }
 0x22b   :  { %v609_v51 = vpop.f32.mrb[10].mxu1 }
 0x22c   :  { %763 = vst [vmem:[#allocation8 + $0x40] sm:$0xff] %v731_v50  ;;  %v610_v52 = vadd.f32 %v1242_v16, %v609_v51  ;;  %v611_v54 = vpop.f32.mrb[11].mxu1 }
 0x22e   :  { %v732_v55 = vmax.f32 %v610_v52, 0.0 }
 0x22f   :  { %v614_v56 = vpop.f32.mrb[12].mxu1 }
 0x230   :  { %764 = vst [vmem:[#allocation8 + $0x48] sm:$0xff] %v732_v55  ;;  %v615_v57 = vadd.f32 %v1242_v16, %v614_v56  ;;  %v616_v58 = vpop.f32.mrb[13].mxu1 }
 0x232   :  { %v733_v59 = vmax.f32 %v615_v57, 0.0 }
 0x233   :  { %v619_v60 = vpop.f32.mrb[14].mxu1 }
 0x234   :  { %765 = vst [vmem:[#allocation8 + $0x50] sm:$0xff] %v733_v59  ;;  %v620_v61 = vadd.f32 %v1242_v16, %v619_v60  ;;  %v621_v62 = vpop.f32.mrb[15].mxu1 }
 0x236   :  { %v734_v53 = vmax.f32 %v620_v61, 0.0 }
 0x237   :  { %v624_v63 = vpop.f32.mrb[16].mxu1 }
 0x238   :  { %766 = vst [vmem:[#allocation8 + $0x58] sm:$0xff] %v734_v53  ;;  %v625_v1 = vadd.f32 %v1242_v16, %v624_v63  ;;  %v626_v2 = vpop.f32.mrb[17].mxu1 }
 0x23a   :  { %v735_v3 = vmax.f32 %v625_v1, 0.0 }
 0x23b   :  { %v629_v4 = vpop.f32.mrb[18].mxu1 }
 0x23c   :  { %767 = vst [vmem:[#allocation8 + $0x60] sm:$0xff] %v735_v3  ;;  %v630_v5 = vadd.f32 %v1242_v16, %v629_v4  ;;  %v631_v6 = vpop.f32.mrb[19].mxu1 }
 0x23e   :  { %v736_v7 = vmax.f32 %v630_v5, 0.0 }
 0x23f   :  { %v634_v8 = vpop.f32.mrb[20].mxu1 }
 0x240   :  { %768 = vst [vmem:[#allocation8 + $0x68] sm:$0xff] %v736_v7  ;;  %v635_v11 = vadd.f32 %v1242_v16, %v634_v8  ;;  %v636_v12 = vpop.f32.mrb[21].mxu1 }
 0x242   :  { %v737_v13 = vmax.f32 %v635_v11, 0.0 }
 0x243   :  { %v639_v0 = vpop.f32.mrb[22].mxu1 }
 0x244   :  { %769 = vst [vmem:[#allocation8 + $0x70] sm:$0xff] %v737_v13  ;;  %v640_v14 = vadd.f32 %v1242_v16, %v639_v0  ;;  %v641_v15 = vpop.f32.mrb[23].mxu1 }
 0x246   :  { %v738_v17 = vmax.f32 %v640_v14, 0.0 }
 0x247   :  { %v644_v18 = vpop.f32.mrb[24].mxu1 }
 0x248   :  { %770 = vst [vmem:[#allocation8 + $0x78] sm:$0xff] %v738_v17  ;;  %v645_v19 = vadd.f32 %v1242_v16, %v644_v18  ;;  %v646_v20 = vpop.f32.mrb[25].mxu1 }
 0x24a   :  { %v739_v9 = vmax.f32 %v645_v19, 0.0 }
 0x24b   :  { %v649_v10 = vpop.f32.mrb[26].mxu1 }
 0x24c   :  { %771 = vst [vmem:[#allocation8 + $0x80] sm:$0xff] %v739_v9  ;;  %v650_v21 = vadd.f32 %v1242_v16, %v649_v10  ;;  %v651_v22 = vpop.f32.mrb[27].mxu1 }
 0x24e   :  { %v740_v23 = vmax.f32 %v650_v21, 0.0 }
 0x24f   :  { %v654_v24 = vpop.f32.mrb[28].mxu1 }
 0x250   :  { %772 = vst [vmem:[#allocation8 + $0x88] sm:$0xff] %v740_v23  ;;  %v655_v25 = vadd.f32 %v1242_v16, %v654_v24  ;;  %v656_v26 = vpop.f32.mrb[29].mxu1 }
 0x252   :  { %v741_v27 = vmax.f32 %v655_v25, 0.0 }
 0x253   :  { %v659_v28 = vpop.f32.mrb[30].mxu1 }
 0x254   :  { %773 = vst [vmem:[#allocation8 + $0x90] sm:$0xff] %v741_v27  ;;  %v660_v29 = vadd.f32 %v1242_v16, %v659_v28  ;;  %v661_v30 = vpop.f32.mrb[31].mxu1 }
 0x256   :  { %v742_v31 = vmax.f32 %v660_v29, 0.0 }
 0x257   :  { %v664_v32 = vpop.f32.mrb[32].mxu1 }
 0x258   :  { %774 = vst [vmem:[#allocation8 + $0x98] sm:$0xff] %v742_v31  ;;  %v665_v33 = vadd.f32 %v1242_v16, %v664_v32  ;;  %v666_v34 = vpop.f32.mrb[33].mxu1 }
 0x25a   :  { %v743_v35 = vmax.f32 %v665_v33, 0.0 }
 0x25b   :  { %v669_v36 = vpop.f32.mrb[34].mxu1 }
 0x25c   :  { %775 = vst [vmem:[#allocation8 + $0xa0] sm:$0xff] %v743_v35  ;;  %v670_v37 = vadd.f32 %v1242_v16, %v669_v36  ;;  %v671_v38 = vpop.f32.mrb[35].mxu1 }
 0x25e   :  { %v744_v39 = vmax.f32 %v670_v37, 0.0 }
 0x25f   :  { %v674_v40 = vpop.f32.mrb[36].mxu1 }
 0x260   :  { %776 = vst [vmem:[#allocation8 + $0xa8] sm:$0xff] %v744_v39  ;;  %v675_v41 = vadd.f32 %v1242_v16, %v674_v40  ;;  %v676_v42 = vpop.f32.mrb[37].mxu1 }
 0x262   :  { %v745_v43 = vmax.f32 %v675_v41, 0.0 }
 0x263   :  { %v679_v44 = vpop.f32.mrb[38].mxu1 }
 0x264   :  { %777 = vst [vmem:[#allocation8 + $0xb0] sm:$0xff] %v745_v43  ;;  %v680_v45 = vadd.f32 %v1242_v16, %v679_v44  ;;  %v681_v46 = vpop.f32.mrb[39].mxu1 }
 0x266   :  { %v746_v47 = vmax.f32 %v680_v45, 0.0 }
 0x267   :  { %v684_v48 = vpop.f32.mrb[40].mxu1 }
 0x268   :  { %778 = vst [vmem:[#allocation8 + $0xb8] sm:$0xff] %v746_v47  ;;  %v685_v49 = vadd.f32 %v1242_v16, %v684_v48  ;;  %v686_v50 = vpop.f32.mrb[41].mxu1 }
 0x26a   :  { %v747_v51 = vmax.f32 %v685_v49, 0.0 }
 0x26b   :  { %v689_v52 = vpop.f32.mrb[42].mxu1 }
 0x26c   :  { %779 = vst [vmem:[#allocation8 + $0xc0] sm:$0xff] %v747_v51  ;;  %v690_v54 = vadd.f32 %v1242_v16, %v689_v52  ;;  %v691_v55 = vpop.f32.mrb[43].mxu1 }
 0x26e   :  { %v748_v56 = vmax.f32 %v690_v54, 0.0 }
 0x26f   :  { %v694_v57 = vpop.f32.mrb[44].mxu1 }
 0x270   :  { %780 = vst [vmem:[#allocation8 + $0xc8] sm:$0xff] %v748_v56  ;;  %v695_v58 = vadd.f32 %v1242_v16, %v694_v57  ;;  %v696_v59 = vpop.f32.mrb[45].mxu1 }
 0x272   :  { %v749_v60 = vmax.f32 %v695_v58, 0.0 }
 0x273   :  { %v699_v61 = vpop.f32.mrb[46].mxu1 }
 0x274   :  { %781 = vst [vmem:[#allocation8 + $0xd0] sm:$0xff] %v749_v60  ;;  %v700_v62 = vadd.f32 %v1242_v16, %v699_v61  ;;  %v701_v53 = vpop.f32.mrb[47].mxu1 }
 0x276   :  { %v750_v63 = vmax.f32 %v700_v62, 0.0 }
 0x277   :  { %v704_v1 = vpop.f32.mrb[48].mxu1 }
 0x278   :  { %782 = vst [vmem:[#allocation8 + $0xd8] sm:$0xff] %v750_v63  ;;  %v705_v2 = vadd.f32 %v1242_v16, %v704_v1  ;;  %v706_v3 = vpop.f32.mrb[49].mxu1 }
 0x27a   :  { %v751_v4 = vmax.f32 %v705_v2, 0.0 }
 0x27b   :  { %v709_v5 = vpop.f32.mrb[50].mxu1 }
 0x27c   :  { %783 = vst [vmem:[#allocation8 + $0xe0] sm:$0xff] %v751_v4  ;;  %v710_v6 = vadd.f32 %v1242_v16, %v709_v5  ;;  %v711_v7 = vpop.f32.mrb[51].mxu1 }
 0x27e   :  { %v752_v8 = vmax.f32 %v710_v6, 0.0 }
 0x27f   :  { %v714_v11 = vpop.f32.mrb[52].mxu1 }
 0x280   :  { %784 = vst [vmem:[#allocation8 + $0xe8] sm:$0xff] %v752_v8  ;;  %v715_v12 = vadd.f32 %v1242_v16, %v714_v11  ;;  %v716_v13 = vpop.f32.mrb[53].mxu1 }
 0x282   :  { %v753_v0 = vmax.f32 %v715_v12, 0.0 }
 0x283   :  { %v719_v14 = vpop.f32.mrb[54].mxu1 }
 0x284   :  { %785 = vst [vmem:[#allocation8 + $0xf0] sm:$0xff] %v753_v0  ;;  %v720_v15 = vadd.f32 %v1242_v16, %v719_v14  ;;  %v721_v17 = vpop.f32.mrb[55].mxu1 }
 0x286   :  { %v754_v18 = vmax.f32 %v720_v15, 0.0 }
 0x288   :  { %786 = vst [vmem:[#allocation8 + $0xf8] sm:$0xff] %v754_v18 }
 0x289   :  { %1005 = shalt.err (!%p1002_p0)
}
 0x28a   :  { %s1006_s12 = scalar_lea.hbm %s1296_s5, 4096 }
 0x28b   :  { %p1007_p1 = scmp.ne.s32.totalorder %s1296_s5, %s1006_s12  ;;  %p1010_p2 = scmp.lt.u32.totalorder %s1006_s12, %s1296_s5 }
 0x28d   :  { %p1012_p3 = pnand %p1010_p2, %p1007_p1 }
 0x28f   :  { %1015 = shalt.err (!%p1012_p3)
}
 0x290   :  { %798 = dma.vmem_to_hbm [thread:$0]  %s793_s8, 4096, %s1296_s5, [#allocation4], %s1026_s1, %s1026_s1, %s1027_s17  }
 0x291   :  { %1020 = dma.done.wait [#allocation4], 4096  }
 0x292   :  { %1021 = vsyncadd [#allocation4], 4294963200 }
 0x293   :  { %802 = vsyncpa [#allocation3], 1 }
 0x294   :  { %803 = vsyncpa [#allocation6], 1 }
 0x295   :  { %804 = vsyncpa [#allocation4], 1 }

</bundles_post_ra>
